<compile_context>
chip_gen: v7x
topology: tpu7x:2x2x1
jax: 0.10.0
libtpu: 0.0.40
codegen_flags: <defaults>
</compile_context>

<pallas_src>
import functools

import numpy as np
import jax
import jax.numpy as jnp
from jax.experimental import pallas as pl
from jax.experimental.pallas import tpu as pltpu


# Network constants implied by the PyTorch module (Linear(16*7*7, 10) => 28x28 input).
H = 28          # input spatial size
C1 = 16         # conv1 out channels
C2 = 16         # conv2 out channels
HP1 = H // 2    # 14
HP2 = HP1 // 2  # 7
NCLS = 10
NPAD = 128      # classes padded to a full lane group for unmasked stores


# ----------------------------------------------------------------------------
# Kernel: one batch tile per grid step, everything VMEM/vreg resident
# ----------------------------------------------------------------------------
def _cnn_kernel(x_ref, w1_ref, b1_ref, s1_ref, w2_ref, b2_ref, s2_ref,
                wfc_ref, bfc_ref, out_ref, *, bt):
    f32 = jnp.float32
    R1 = bt * (H + 2)      # H-padded rows per tile for stage 1 (30 per image)
    R2 = bt * (HP1 + 2)    # H-padded rows per tile for stage 2 (16 per image)

    xp = x_ref[0]                                                       # (R1, 28)

    # ---- conv1 (3x3, 1->16, pad 1) as ONE banded matmul, fused bias + ReLU ----------
    m1 = jnp.concatenate([xp[0:R1 - 2], xp[1:R1 - 1], xp[2:R1]], axis=1)  # (R1-2, 84)
    a1 = jnp.dot(m1, w1_ref[...], preferred_element_type=f32) + b1_ref[...]
    a1 = jnp.maximum(a1, 0.0)                                           # (R1-2, 448)

    # ---- maxpool 2x2 #1: W via lane-half max, H via adjacent max + selection matmul --
    aw = jnp.maximum(a1[:, :224], a1[:, 224:])                          # (R1-2, 224)
    hm1 = jnp.maximum(aw[:-1], aw[1:])                                  # (R1-3, 224)
    pp = jnp.dot(s1_ref[...], hm1, preferred_element_type=f32)          # (R2, 224)

    # ---- conv2 (3x3, 16->16, pad 1) as ONE banded matmul, fused bias + ReLU ----------
    m2 = jnp.concatenate([pp[0:R2 - 2], pp[1:R2 - 1], pp[2:R2]], axis=1)  # (R2-2, 672)
    a2 = jnp.dot(m2, w2_ref[...], preferred_element_type=f32) + b2_ref[...]
    a2 = jnp.maximum(a2, 0.0)                                           # (R2-2, 224)

    # ---- maxpool 2x2 #2 --------------------------------------------------------------
    a2w = jnp.maximum(a2[:, :112], a2[:, 112:])                         # (R2-2, 112)
    hm2 = jnp.maximum(a2w[:-1], a2w[1:])                                # (R2-3, 112)
    p2 = jnp.dot(s2_ref[...], hm2, preferred_element_type=f32)          # (7*bt, 112)

    # ---- flatten (row t, col jj, channel c) + FC, one matmul per tile ----------------
    flat = jnp.concatenate([p2[t * bt:(t + 1) * bt] for t in range(HP2)],
                           axis=1)                                      # (bt, 784)
    out_ref[0] = (jnp.dot(flat, wfc_ref[...], preferred_element_type=f32)
                  + bfc_ref[...])                                       # (bt, 128)


# ----------------------------------------------------------------------------
# Wrapper: single fused pallas_call over batch tiles
# ----------------------------------------------------------------------------
def cnn_forward(x_nchw, packed, *, b_tile):
    B = x_nchw.shape[0]
    G = -(-B // b_tile)
    Bpad = G * b_tile

    # (B,1,28,28) -> (B,28,28); zero-pad H for conv1 and pad batch to a tile multiple.
    x = x_nchw.astype(jnp.float32).reshape(B, H, H)
    x = jnp.pad(x, ((0, Bpad - B), (1, 1), (0, 0)))          # (Bpad, 30, 28)
    x = x.reshape(G, b_tile * (H + 2), H)                    # contiguous, metadata-only

    kernel = functools.partial(_cnn_kernel, bt=b_tile)

    def full(a):
        return pl.BlockSpec(a.shape, lambda i: (0,) * a.ndim)

    out = pl.pallas_call(
        kernel,
        out_shape=jax.ShapeDtypeStruct((G, b_tile, NPAD), jnp.float32),
        grid=(G,),
        in_specs=[
            pl.BlockSpec((1, b_tile * (H + 2), H), lambda i: (i, 0, 0)),  # input slab
            full(packed["w1"]), full(packed["b1"]), full(packed["s1"]),
            full(packed["w2"]), full(packed["b2"]), full(packed["s2"]),
            full(packed["wfc"]), full(packed["bfc"]),
        ],
        out_specs=pl.BlockSpec((1, b_tile, NPAD), lambda i: (i, 0, 0)),
        compiler_params=pltpu.CompilerParams(
            dimension_semantics=("parallel",)),   # batch tiles -> both v7x TensorCores
    )(x, packed["w1"], packed["b1"], packed["s1"], packed["w2"], packed["b2"],
      packed["s2"], packed["wfc"], packed["bfc"])

    return out.reshape(Bpad, NPAD)[:B, :NCLS]


def pick_b_tile(batch):
    """Biggest tile <= 8 that still leaves >= 2 grid steps (when batch permits)."""
    if batch <= 1:
        return 1
    return max(1, min(8, -(-batch // 2)))


# ----------------------------------------------------------------------------
# One-time weight packing (hoisted out of the forward pass)
# ----------------------------------------------------------------------------
def pack_params(p, b_tile):
    f32 = jnp.float32

    # conv1 -> banded (84, 448) matrix; output lanes = (w%2)*224 + (w//2)*16 + c
    kh, kw, w, c = np.meshgrid(np.arange(3), np.arange(3), np.arange(H),
                               np.arange(C1), indexing="ij")
    wi = w + kw - 1
    ok = (wi >= 0) & (wi < H)
    rows = (kh * H + wi)[ok]
    cols = ((w % 2) * 224 + (w // 2) * C1 + c)[ok]
    vals = p["w1"][c[ok], 0, kh[ok], kw[ok]]
    w1big = jnp.zeros((3 * H, 2 * HP1 * C1), f32).at[rows, cols].set(vals)
    b1big = jnp.tile(p["b1"], H).reshape(1, H * C1)

    # conv2 -> banded (672, 224) matrix; output lanes = (j%2)*112 + (j//2)*16 + cout
    kh, kw, j, cin, cout = np.meshgrid(np.arange(3), np.arange(3), np.arange(HP1),
                                       np.arange(C1), np.arange(C2), indexing="ij")
    jj = j + kw - 1
    ok = (jj >= 0) & (jj < HP1)
    rows = (kh * HP1 * C1 + jj * C1 + cin)[ok]
    cols = ((j % 2) * 112 + (j // 2) * C2 + cout)[ok]
    vals = p["w2"][cout[ok], cin[ok], kh[ok], kw[ok]]
    w2big = jnp.zeros((3 * HP1 * C1, HP1 * C2), f32).at[rows, cols].set(vals)
    b2big = jnp.tile(p["b2"], HP1).reshape(1, HP1 * C2)

    # FC: kernel flatten order is (t, jj, c); PyTorch flatten order is (c, t, jj).
    wfc = jnp.transpose(p["w_out"].reshape(NCLS, C2, HP2, HP2),
                        (2, 3, 1, 0)).reshape(HP2 * HP2 * C2, NCLS)
    wfc = jnp.pad(wfc, ((0, 0), (0, NPAD - NCLS)))
    bfc = jnp.pad(p["b_out"].reshape(1, NCLS), ((0, 0), (0, NPAD - NCLS)))

    # Pool-H selection matrices (0/1): decimate rows by 2 and insert conv-pad zero rows.
    bt = b_tile
    s1 = np.zeros((bt * (HP1 + 2), bt * (H + 2) - 3), np.float32)
    for b in range(bt):
        for i in range(HP1):
            s1[b * (HP1 + 2) + i + 1, b * (H + 2) + 2 * i] = 1.0
    s2 = np.zeros((bt * HP2, bt * (HP1 + 2) - 3), np.float32)
    for b in range(bt):
        for t in range(HP2):
            s2[t * bt + b, b * (HP1 + 2) + 2 * t] = 1.0

    return {
        "w1": w1big, "b1": b1big, "s1": jnp.asarray(s1),
        "w2": w2big, "b2": b2big, "s2": jnp.asarray(s2),
        "wfc": wfc, "bfc": bfc,
    }


# ----------------------------------------------------------------------------
# Pure-JAX reference (PyTorch-layout params) for a numerical sanity check
# ----------------------------------------------------------------------------
def cnn_forward_ref(x_nchw, params):
    def conv(x, w, b):
        y = jax.lax.conv_general_dilated(
            x, w, window_strides=(1, 1), padding=((1, 1), (1, 1)),
            dimension_numbers=("NCHW", "OIHW", "NCHW"))
        return jnp.maximum(y + b[None, :, None, None], 0.0)

    def pool(x):
        b, c, hh, ww = x.shape
        return x.reshape(b, c, hh // 2, 2, ww // 2, 2).max(axis=(3, 5))

    x = pool(conv(x_nchw, params["w1"], params["b1"]))
    x = pool(conv(x, params["w2"], params["b2"]))
    x = x.reshape(x.shape[0], -1)
    return x @ params["w_out"].T + params["b_out"]


def init_params(key):
    k1, k2, k3, k4, k5, k6 = jax.random.split(key, 6)
    return {
        "w1": 0.1 * jax.random.normal(k1, (C1, 1, 3, 3), jnp.float32),
        "b1": 0.1 * jax.random.normal(k2, (C1,), jnp.float32),
        "w2": 0.05 * jax.random.normal(k3, (C2, C1, 3, 3), jnp.float32),
        "b2": 0.05 * jax.random.normal(k4, (C2,), jnp.float32),
        "w_out": 0.02 * jax.random.normal(k5, (NCLS, C2 * HP2 * HP2), jnp.float32),
        "b_out": 0.02 * jax.random.normal(k6, (NCLS,), jnp.float32),
    }


if __name__ == "__main__":
    key = jax.random.PRNGKey(0)
    kx, kp = jax.random.split(key)
    # MNIST-like input implied by Linear(16*7*7, 10): (B, 1, 28, 28)
    B = 4
    x = jax.random.normal(kx, (B, 1, H, H), jnp.float32)
    params = init_params(kp)

    b_tile = pick_b_tile(B)          # -> 2 images per grid step, grid=(2,)
    packed = pack_params(params, b_tile)

    fwd = jax.jit(functools.partial(cnn_forward, b_tile=b_tile))
    logits = jax.block_until_ready(fwd(x, packed))
    assert logits.shape == (B, NCLS), logits.shape

    ref = jax.block_until_ready(cnn_forward_ref(x, params))
    assert jnp.allclose(logits, ref, atol=5e-3, rtol=5e-3), (
        float(jnp.max(jnp.abs(logits - ref))))

    print("KERNEL_OK")
</pallas_src>

<mosaic_0001>
module attributes {stable_mosaic.version = 11 : i64} {
  func.func @_cnn_kernel(%arg0: i32, %arg1: memref<1x60x28xf32, #tpu.memory_space<vmem>>, %arg2: memref<84x448xf32, #tpu.memory_space<vmem>>, %arg3: memref<1x448xf32, #tpu.memory_space<vmem>>, %arg4: memref<32x57xf32, #tpu.memory_space<vmem>>, %arg5: memref<672x224xf32, #tpu.memory_space<vmem>>, %arg6: memref<1x224xf32, #tpu.memory_space<vmem>>, %arg7: memref<14x29xf32, #tpu.memory_space<vmem>>, %arg8: memref<784x128xf32, #tpu.memory_space<vmem>>, %arg9: memref<1x128xf32, #tpu.memory_space<vmem>>, %arg10: memref<1x2x128xf32, #tpu.memory_space<vmem>>) attributes {dimension_semantics = [#tpu.dimension_semantics<parallel>], iteration_bounds = array<i64: 2>, scalar_prefetch = 0 : i64, scratch_operands = 0 : i64, tpu.core_type = #tpu.core_type<tc>, window_params = [{transform_indices = @transform_0, window_bounds = array<i64: 1, 60, 28>}, {pipeline_mode = #tpu.pipeline_mode<synchronous>, transform_indices = @transform_1, window_bounds = array<i64: 84, 448>}, {pipeline_mode = #tpu.pipeline_mode<synchronous>, transform_indices = @transform_2, window_bounds = array<i64: 1, 448>}, {pipeline_mode = #tpu.pipeline_mode<synchronous>, transform_indices = @transform_3, window_bounds = array<i64: 32, 57>}, {pipeline_mode = #tpu.pipeline_mode<synchronous>, transform_indices = @transform_4, window_bounds = array<i64: 672, 224>}, {pipeline_mode = #tpu.pipeline_mode<synchronous>, transform_indices = @transform_5, window_bounds = array<i64: 1, 224>}, {pipeline_mode = #tpu.pipeline_mode<synchronous>, transform_indices = @transform_6, window_bounds = array<i64: 14, 29>}, {pipeline_mode = #tpu.pipeline_mode<synchronous>, transform_indices = @transform_7, window_bounds = array<i64: 784, 128>}, {pipeline_mode = #tpu.pipeline_mode<synchronous>, transform_indices = @transform_8, window_bounds = array<i64: 1, 128>}, {transform_indices = @transform_9, window_bounds = array<i64: 1, 2, 128>}]} {
    %c0 = arith.constant 0 : index
    %c0_0 = arith.constant 0 : index
    %c0_1 = arith.constant 0 : index
    %0 = vector.load %arg1[%c0, %c0_0, %c0_1] : memref<1x60x28xf32, #tpu.memory_space<vmem>>, vector<1x60x28xf32>
    %1 = vector.shape_cast %0 : vector<1x60x28xf32> to vector<60x28xf32>
    %2 = vector.extract_strided_slice %1 {offsets = [0, 0], sizes = [58, 28], strides = [1, 1]} : vector<60x28xf32> to vector<58x28xf32>
    %3 = vector.extract_strided_slice %1 {offsets = [1, 0], sizes = [58, 28], strides = [1, 1]} : vector<60x28xf32> to vector<58x28xf32>
    %4 = vector.extract_strided_slice %1 {offsets = [2, 0], sizes = [58, 28], strides = [1, 1]} : vector<60x28xf32> to vector<58x28xf32>
    %5 = tpu.concatenate %2, %3, %4 in 1 : vector<58x28xf32>, vector<58x28xf32>, vector<58x28xf32> -> vector<58x84xf32>
    %c0_2 = arith.constant 0 : index
    %c0_3 = arith.constant 0 : index
    %6 = vector.load %arg2[%c0_2, %c0_3] : memref<84x448xf32, #tpu.memory_space<vmem>>, vector<84x448xf32>
    %cst = arith.constant dense<0.000000e+00> : vector<58x448xf32>
    %7 = tpu.matmul %5, %6, %cst {dimension_numbers = #tpu.dot_dimension_numbers<[1], [0], [0], [1], [0, 0, 1, 1], [], []>} : vector<58x84xf32>, vector<84x448xf32>, vector<58x448xf32> -> vector<58x448xf32>
    %c0_4 = arith.constant 0 : index
    %c0_5 = arith.constant 0 : index
    %8 = vector.load %arg3[%c0_4, %c0_5] : memref<1x448xf32, #tpu.memory_space<vmem>>, vector<1x448xf32>
    %9 = vector.broadcast %8 : vector<1x448xf32> to vector<58x448xf32>
    %10 = arith.addf %7, %9 : vector<58x448xf32>
    %cst_6 = arith.constant 0.000000e+00 : f32
    %11 = vector.broadcast %cst_6 : f32 to vector<58x448xf32>
    %12 = arith.maximumf %10, %11 : vector<58x448xf32>
    %13 = vector.extract_strided_slice %12 {offsets = [0, 0], sizes = [58, 224], strides = [1, 1]} : vector<58x448xf32> to vector<58x224xf32>
    %14 = vector.extract_strided_slice %12 {offsets = [0, 224], sizes = [58, 224], strides = [1, 1]} : vector<58x448xf32> to vector<58x224xf32>
    %15 = arith.maximumf %13, %14 : vector<58x224xf32>
    %16 = vector.extract_strided_slice %15 {offsets = [0, 0], sizes = [57, 224], strides = [1, 1]} : vector<58x224xf32> to vector<57x224xf32>
    %17 = vector.extract_strided_slice %15 {offsets = [1, 0], sizes = [57, 224], strides = [1, 1]} : vector<58x224xf32> to vector<57x224xf32>
    %18 = arith.maximumf %16, %17 : vector<57x224xf32>
    %c0_7 = arith.constant 0 : index
    %c0_8 = arith.constant 0 : index
    %19 = vector.load %arg4[%c0_7, %c0_8] : memref<32x57xf32, #tpu.memory_space<vmem>>, vector<32x57xf32>
    %cst_9 = arith.constant dense<0.000000e+00> : vector<32x224xf32>
    %20 = tpu.matmul %19, %18, %cst_9 {dimension_numbers = #tpu.dot_dimension_numbers<[1], [0], [0], [1], [0, 0, 1, 1], [], []>} : vector<32x57xf32>, vector<57x224xf32>, vector<32x224xf32> -> vector<32x224xf32>
    %21 = vector.extract_strided_slice %20 {offsets = [0, 0], sizes = [30, 224], strides = [1, 1]} : vector<32x224xf32> to vector<30x224xf32>
    %22 = vector.extract_strided_slice %20 {offsets = [1, 0], sizes = [30, 224], strides = [1, 1]} : vector<32x224xf32> to vector<30x224xf32>
    %23 = vector.extract_strided_slice %20 {offsets = [2, 0], sizes = [30, 224], strides = [1, 1]} : vector<32x224xf32> to vector<30x224xf32>
    %24 = tpu.concatenate %21, %22, %23 in 1 : vector<30x224xf32>, vector<30x224xf32>, vector<30x224xf32> -> vector<30x672xf32>
    %c0_10 = arith.constant 0 : index
    %c0_11 = arith.constant 0 : index
    %25 = vector.load %arg5[%c0_10, %c0_11] : memref<672x224xf32, #tpu.memory_space<vmem>>, vector<672x224xf32>
    %cst_12 = arith.constant dense<0.000000e+00> : vector<30x224xf32>
    %26 = tpu.matmul %24, %25, %cst_12 {dimension_numbers = #tpu.dot_dimension_numbers<[1], [0], [0], [1], [0, 0, 1, 1], [], []>} : vector<30x672xf32>, vector<672x224xf32>, vector<30x224xf32> -> vector<30x224xf32>
    %c0_13 = arith.constant 0 : index
    %c0_14 = arith.constant 0 : index
    %27 = vector.load %arg6[%c0_13, %c0_14] : memref<1x224xf32, #tpu.memory_space<vmem>>, vector<1x224xf32>
    %28 = vector.broadcast %27 : vector<1x224xf32> to vector<30x224xf32>
    %29 = arith.addf %26, %28 : vector<30x224xf32>
    %cst_15 = arith.constant 0.000000e+00 : f32
    %30 = vector.broadcast %cst_15 : f32 to vector<30x224xf32>
    %31 = arith.maximumf %29, %30 : vector<30x224xf32>
    %32 = vector.extract_strided_slice %31 {offsets = [0, 0], sizes = [30, 112], strides = [1, 1]} : vector<30x224xf32> to vector<30x112xf32>
    %33 = vector.extract_strided_slice %31 {offsets = [0, 112], sizes = [30, 112], strides = [1, 1]} : vector<30x224xf32> to vector<30x112xf32>
    %34 = arith.maximumf %32, %33 : vector<30x112xf32>
    %35 = vector.extract_strided_slice %34 {offsets = [0, 0], sizes = [29, 112], strides = [1, 1]} : vector<30x112xf32> to vector<29x112xf32>
    %36 = vector.extract_strided_slice %34 {offsets = [1, 0], sizes = [29, 112], strides = [1, 1]} : vector<30x112xf32> to vector<29x112xf32>
    %37 = arith.maximumf %35, %36 : vector<29x112xf32>
    %c0_16 = arith.constant 0 : index
    %c0_17 = arith.constant 0 : index
    %38 = vector.load %arg7[%c0_16, %c0_17] : memref<14x29xf32, #tpu.memory_space<vmem>>, vector<14x29xf32>
    %cst_18 = arith.constant dense<0.000000e+00> : vector<14x112xf32>
    %39 = tpu.matmul %38, %37, %cst_18 {dimension_numbers = #tpu.dot_dimension_numbers<[1], [0], [0], [1], [0, 0, 1, 1], [], []>} : vector<14x29xf32>, vector<29x112xf32>, vector<14x112xf32> -> vector<14x112xf32>
    %40 = vector.extract_strided_slice %39 {offsets = [0, 0], sizes = [2, 112], strides = [1, 1]} : vector<14x112xf32> to vector<2x112xf32>
    %41 = vector.extract_strided_slice %39 {offsets = [2, 0], sizes = [2, 112], strides = [1, 1]} : vector<14x112xf32> to vector<2x112xf32>
    %42 = vector.extract_strided_slice %39 {offsets = [4, 0], sizes = [2, 112], strides = [1, 1]} : vector<14x112xf32> to vector<2x112xf32>
    %43 = vector.extract_strided_slice %39 {offsets = [6, 0], sizes = [2, 112], strides = [1, 1]} : vector<14x112xf32> to vector<2x112xf32>
    %44 = vector.extract_strided_slice %39 {offsets = [8, 0], sizes = [2, 112], strides = [1, 1]} : vector<14x112xf32> to vector<2x112xf32>
    %45 = vector.extract_strided_slice %39 {offsets = [10, 0], sizes = [2, 112], strides = [1, 1]} : vector<14x112xf32> to vector<2x112xf32>
    %46 = vector.extract_strided_slice %39 {offsets = [12, 0], sizes = [2, 112], strides = [1, 1]} : vector<14x112xf32> to vector<2x112xf32>
    %47 = tpu.concatenate %40, %41, %42, %43, %44, %45, %46 in 1 : vector<2x112xf32>, vector<2x112xf32>, vector<2x112xf32>, vector<2x112xf32>, vector<2x112xf32>, vector<2x112xf32>, vector<2x112xf32> -> vector<2x784xf32>
    %c0_19 = arith.constant 0 : index
    %c0_20 = arith.constant 0 : index
    %48 = vector.load %arg8[%c0_19, %c0_20] : memref<784x128xf32, #tpu.memory_space<vmem>>, vector<784x128xf32>
    %cst_21 = arith.constant dense<0.000000e+00> : vector<2x128xf32>
    %49 = tpu.matmul %47, %48, %cst_21 {dimension_numbers = #tpu.dot_dimension_numbers<[1], [0], [0], [1], [0, 0, 1, 1], [], []>} : vector<2x784xf32>, vector<784x128xf32>, vector<2x128xf32> -> vector<2x128xf32>
    %c0_22 = arith.constant 0 : index
    %c0_23 = arith.constant 0 : index
    %50 = vector.load %arg9[%c0_22, %c0_23] : memref<1x128xf32, #tpu.memory_space<vmem>>, vector<1x128xf32>
    %51 = vector.broadcast %50 : vector<1x128xf32> to vector<2x128xf32>
    %52 = arith.addf %49, %51 : vector<2x128xf32>
    %c0_24 = arith.constant 0 : index
    %c0_25 = arith.constant 0 : index
    %c0_26 = arith.constant 0 : index
    %53 = vector.load %arg10[%c0_24, %c0_25, %c0_26] : memref<1x2x128xf32, #tpu.memory_space<vmem>>, vector<1x2x128xf32>
    %54 = vector.shape_cast %53 : vector<1x2x128xf32> to vector<2x128xf32>
    %55 = vector.shape_cast %52 : vector<2x128xf32> to vector<1x2x128xf32>
    tpu.vector_store %arg10[%c0_24, %c0_25, %c0_26], %55 {strides = array<i32>} : memref<1x2x128xf32, #tpu.memory_space<vmem>>, vector<1x2x128xf32>,
    return
  }
  func.func @transform_0(%arg0: i32) -> (i32, i32, i32) {
    %c0_i32 = arith.constant 0 : i32
    %c0_i32_0 = arith.constant 0 : i32
    %c0_i32_1 = arith.constant 0 : i32
    return %arg0, %c0_i32, %c0_i32_0 : i32, i32, i32
  }
  func.func @transform_1(%arg0: i32) -> (i32, i32) {
    %c0_i32 = arith.constant 0 : i32
    %c0_i32_0 = arith.constant 0 : i32
    %c0_i32_1 = arith.constant 0 : i32
    return %c0_i32, %c0_i32_0 : i32, i32
  }
  func.func @transform_2(%arg0: i32) -> (i32, i32) {
    %c0_i32 = arith.constant 0 : i32
    %c0_i32_0 = arith.constant 0 : i32
    %c0_i32_1 = arith.constant 0 : i32
    return %c0_i32, %c0_i32_0 : i32, i32
  }
  func.func @transform_3(%arg0: i32) -> (i32, i32) {
    %c0_i32 = arith.constant 0 : i32
    %c0_i32_0 = arith.constant 0 : i32
    %c0_i32_1 = arith.constant 0 : i32
    return %c0_i32, %c0_i32_0 : i32, i32
  }
  func.func @transform_4(%arg0: i32) -> (i32, i32) {
    %c0_i32 = arith.constant 0 : i32
    %c0_i32_0 = arith.constant 0 : i32
    %c0_i32_1 = arith.constant 0 : i32
    return %c0_i32, %c0_i32_0 : i32, i32
  }
  func.func @transform_5(%arg0: i32) -> (i32, i32) {
    %c0_i32 = arith.constant 0 : i32
    %c0_i32_0 = arith.constant 0 : i32
    %c0_i32_1 = arith.constant 0 : i32
    return %c0_i32, %c0_i32_0 : i32, i32
  }
  func.func @transform_6(%arg0: i32) -> (i32, i32) {
    %c0_i32 = arith.constant 0 : i32
    %c0_i32_0 = arith.constant 0 : i32
    %c0_i32_1 = arith.constant 0 : i32
    return %c0_i32, %c0_i32_0 : i32, i32
  }
  func.func @transform_7(%arg0: i32) -> (i32, i32) {
    %c0_i32 = arith.constant 0 : i32
    %c0_i32_0 = arith.constant 0 : i32
    %c0_i32_1 = arith.constant 0 : i32
    return %c0_i32, %c0_i32_0 : i32, i32
  }
  func.func @transform_8(%arg0: i32) -> (i32, i32) {
    %c0_i32 = arith.constant 0 : i32
    %c0_i32_0 = arith.constant 0 : i32
    %c0_i32_1 = arith.constant 0 : i32
    return %c0_i32, %c0_i32_0 : i32, i32
  }
  func.func @transform_9(%arg0: i32) -> (i32, i32, i32) {
    %c0_i32 = arith.constant 0 : i32
    %c0_i32_0 = arith.constant 0 : i32
    %c0_i32_1 = arith.constant 0 : i32
    return %arg0, %c0_i32, %c0_i32_0 : i32, i32, i32
  }
}

</mosaic_0001>

<bundles_post_ra>
// kernel: cnn_forward.1
= control target key start
LH: loop header
LB: loop body
LE: loop exit
PB: predicated region body
PF: predicated region fallthrough
CT: control target
= control target key end

     0   :  { %14 = vsyncpa [#allocation3], 0  ;;  %s4258_s0 = inlined_call_operand.vmem [shape: f32[2,60,28], index: 0, kind: input, shape index: {}]   ;;  %s4259_s1 = inlined_call_operand.hbm [shape: f32[84,448], index: 1, kind: input, shape index: {}]   ;;  %s4260_s2 = inlined_call_operand.vmem [shape: f32[1,448], index: 2, kind: input, shape index: {}]   ;;  %s4261_s3 = inlined_call_operand.vmem [shape: f32[32,57], index: 3, kind: input, shape index: {}]   ;;  %s4262_s4 = inlined_call_operand.hbm [shape: f32[672,224], index: 4, kind: input, shape index: {}]   ;;  %s4263_s5 = inlined_call_operand.vmem [shape: f32[1,224], index: 5, kind: input, shape index: {}]   ;;  %s4264_s6 = inlined_call_operand.vmem [shape: f32[14,29], index: 6, kind: input, shape index: {}]   ;;  %s4265_s7 = inlined_call_operand.vmem [shape: f32[784,128], index: 7, kind: input, shape index: {}]   ;;  %s4266_s8 = inlined_call_operand.vmem [shape: f32[1,128], index: 8, kind: input, shape index: {}]   ;;  %s4267_s9 = inlined_call_operand.hbm [shape: f32[2,2,128], index: 9, kind: output, shape index: {}]  }
   0x1   :  { %15 = vsyncpa [#allocation6], 0 }
   0x2   :  { %16 = vsyncpa [#allocation4], 0 }
   0x3   :  { %18 = vsyncpa [#allocation4 + $0x1], 0  ;;  %s3276_s30 = smov 0   ;;  %s3278_s10 = smov 0  }
   0x4   :  { %s3280_s11 = smov 0   ;;  %s3282_s12 = smov 0  }
   0x5 LB: > { %4274 = sst [smem:[#allocation11_spill]] %s3200_s11  ;;  %s3297_s13 = sadd.s32 4294967295, %s3204_s12   ;;  %s3204_s12 = sphi %s3282_s12, %s4288_s12   ;;  %s3200_s11 = sphi %s3280_s11, %s4290_s11   ;;  %s3196_s10 = sphi %s3278_s10, %s4292_s10   ;;  %s3192_s30 = sphi %s3276_s30, %s4291_s30  }
   0x6   : > { %s2379_s14 = sadd.s32 4294967294, %s3204_s12   ;;  %s3301_s15 = sadd.s32 1, %s3204_s12  }
   0x7   : > { %4275 = sst [smem:[#allocation12_spill]] %s3301_s15  ;;  %s225_s16 = sadd.s32 1, %s3200_s11 }
   0x8   : > { %s222_s17 = ssub.s32 %s3204_s12, %s3301_s15  ;;  %p235_p0 = scmp.ne.s32.totalorder %s3200_s11, %s3196_s10 }
   0x9   : > { %p223_p1 = scmp.eq.s32.totalorder %s222_s17, 0  ;;  %p236_p2 = scmp.eq.s32.totalorder %s3297_s13, 1 }
   0xa   : > { %p241_p3 = scmp.ne.s32.totalorder %s3196_s10, %s3192_s30  ;;  %p242_p4 = scmp.eq.s32.totalorder %s2379_s14, 1 }
   0xb   : > { %s3312_s18 = scalar_select %p223_p1, %s3200_s11, %s225_s16  }
   0xc   : > { %p3314_p5 = por %p236_p2, %p235_p0  ;;  %p3318_p6 = por %p242_p4, %p241_p3 }
   0xd   : > { %4276 = sst [smem:[#allocation13_spill]] %s3312_s18  ;;  %p2380_p7 = scmp.ge.s32.totalorder %s3204_s12, 1 }
   0xe   : > { %s4277_s19 = scalar_select %p3314_p5, 1, 0 }
   0xf   : > { %s4278_s20 = scalar_select %p3318_p6, 1, 0 }
  0x10   : > { %p249_p8 = scmp.lt.s32.totalorder %s3204_s12, 3  ;;  %p4268_p9 = scmp.eq.s32.totalorder %s3297_s13, 0 }
  0x11   : > { %s3206_s22 = smov [#allocation2]   ;;  %s3207_s25 = smov [#allocation5]  }
  0x12   : > { %p3325_p10 = pnand %p2380_p7, %p249_p8  ;;  %s261_s23 = sshll.u32 %s3206_s22, 4  ;;  %s262_s23 = int_to_ptr.vmem [resolvable:$true] %s261_s23 }
  0x13   : > { %s280_s26 = sshll.u32 %s3207_s25, 4  ;;  %s3078_s29 = scalar_lea.hbm %s4259_s1, 5632  ;;  %s3337_s26 = int_to_ptr.vmem [resolvable:$true] %s280_s26 }
  0x14   : > { %s4279_s21 = scalar_select %p3325_p10, 1, 0 }
  0x15   : > { %p2931_p11 = pneg %p3325_p10  ;;  %p3079_p13 = scmp.ne.s32.totalorder %s4259_s1, %s3078_s29 }
  0x16   : > { %p3085_p3 = scmp.lt.u32.totalorder %s3078_s29, %s4259_s1 }
  0x17   : > { %p3333_p12 = pnand %p4268_p9, %p2931_p11 }
  0x19   : > { %p3080_p0 = pneg %p3333_p12 }
  0x1b   : > { %p3081_p1 = pnand %p3080_p0, %p3079_p13 }
  0x1d   : > { %p3082_p2 = pneg %p3081_p1 }
  0x1f   : > { %p3087_p4 = pnand %p3085_p3, %p3082_p2 }
  0x21   : > { %3090 = shalt.err (!%p3087_p4)
}
  0x22   : > { %s3091_s25 = scalar_lea.vmem %s262_s23, 5632  ;;  %p3099_p9 = scmp.lt.s32.totalorder %s262_s23, %s262_s23 }
  0x23   : > { %p3092_p7 = scmp.ne.s32.totalorder %s262_s23, %s3091_s25  ;;  %p3100_p6 = scmp.lt.s32.totalorder %s3091_s25, %s3091_s25 }
  0x25   : > { %p3094_p8 = pnand %p3092_p7, %p3080_p0  ;;  %p3101_p5 = por %p3100_p6, %p3099_p9 }
  0x27   : > { %p3095_p11 = pneg %p3094_p8 }
  0x29   : > { %p3102_p10 = pnand %p3101_p5, %p3095_p11 }
  0x2b   : > { %3105 = shalt.err (!%p3102_p10)
}
  0x2c   : > { %s3208_s27 = smov 512   ;;  %s3209_s28 = smov 32  }
  0x2d   : > { %2934 = dma.hbm_to_vmem [thread:$0]  (!%p3333_p12), %s4259_s1, 5632, %s262_s23, [#allocation3], %s3208_s27, %s3208_s27, %s3209_s28  }
  0x2e   : > { %s3106_s22 = scalar_lea.hbm %s4262_s4, 21504 }
  0x2f   : > { %p3107_p13 = scmp.ne.s32.totalorder %s4262_s4, %s3106_s22  ;;  %p3113_p9 = scmp.lt.u32.totalorder %s3106_s22, %s4262_s4 }
  0x31   : > { %p3109_p5 = pnand %p3107_p13, %p3080_p0 }
  0x33   : > { %p3110_p6 = pneg %p3109_p5 }
  0x35   : > { %p3115_p10 = pnand %p3113_p9, %p3110_p6 }
  0x37   : > { %3118 = shalt.err (!%p3115_p10)
}
  0x38   : > { %s3119_s23 = scalar_lea.vmem %s3337_s26, 21504  ;;  %p3127_p4 = scmp.lt.s32.totalorder %s3337_s26, %s3337_s26 }
  0x39   : > { %p3120_p1 = scmp.ne.s32.totalorder %s3337_s26, %s3119_s23  ;;  %p3128_p7 = scmp.lt.s32.totalorder %s3119_s23, %s3119_s23 }
  0x3b   : > { %p3122_p2 = pnand %p3120_p1, %p3080_p0  ;;  %p3129_p8 = por %p3128_p7, %p3127_p4 }
  0x3d   : > { %p3123_p3 = pneg %p3122_p2 }
  0x3f   : > { %p3130_p11 = pnand %p3129_p8, %p3123_p3 }
  0x41   : > { %3133 = shalt.err (!%p3130_p11)
}
  0x42   : > { %s3210_s11 = smov 256   ;;  %s3211_s15 = smov 16  }
  0x43   : > { %2937 = dma.hbm_to_vmem [thread:$0]  (!%p3333_p12), %s4262_s4, 21504, %s3337_s26, [#allocation6], %s3210_s11, %s3210_s11, %s3211_s15  }
  0x44   : > { %p4281_p13 = scmp.ne.s32.totalorder %s4279_s21, 0 }
  0x45   : > { %p4282_p0 = scmp.eq.s32.totalorder (!%p4281_p13), %s3297_s13, 0 }
  0x46   : > { %316 = sbr.rel (%p4281_p13) target bundleno = 2022 (0x7e6), region = 56 }
  0x4d   : > { %3179 = dma.done.wait (%p4282_p0), [#allocation3], 5632   ;;  %p4283_p5 = pmov %p4282_p0 }
  0x4e   : > { %p4284_p6 = pmov %p4282_p0 }
  0x4f   : > { %3181 = vsyncadd (%p4283_p5), [#allocation3], 4294961664 }
  0x50   : > { %3183 = dma.done.wait (%p4284_p6), [#allocation6], 21504   ;;  %p4285_p9 = pmov %p4282_p0 }
  0x51   : > { %p356_p10 = scmp.lt.s32.totalorder %s3297_s13, 1  ;;  %v3212_v0 = vmov 0.0   ;;  %vm377_vm0 = vcmask 1046528   ;;  %vm417_vm1 = vcmask 1045504   ;;  %v476_v14 = vld [vmem:[#allocation2 + $0x8] sm:$0xff]  ;;  %s3213_s14 = smov 28  }
  0x52   : > { %3185 = vsyncadd (%p4285_p9), [#allocation6], 4294945792  ;;  %643 = vmatprep.mubr.f32.mxu0 %v3212_v0  ;;  %756 = vmatprep.mubr.f32.mxu1 %v3212_v0  ;;  %v480_v16 = vld [vmem:[#allocation2 + $0x28] sm:$0xff]  ;;  %v478_v17 = vld [vmem:[#allocation2 + $0x18] sm:$0xff]  ;;  %s3214_s16 = smov 56   ;;  %vm566_vm2 = vcmask 1043456  }
  0x53   : > { %s357_s24 = scalar_select %p356_p10, %s3297_s13, 1  ;;  %v482_v18 = vld [vmem:[#allocation2 + $0x38] sm:$0xff]  ;;  %v475_v22 = vld [vmem:[#allocation2] sm:$0xff]  ;;  %v477_v24 = vld [vmem:[#allocation2 + $0x10] sm:$0xff]  ;;  %v2562_v28 = vpack.c.bf16 %v480_v16, %v476_v14  ;;  %vm457_vm3 = vcmask 228352   ;;  %vm466_vm4 = vcmask 457728  }
  0x54   : > { %v479_v23 = vld [vmem:[#allocation2 + $0x20] sm:$0xff]  ;;  %v481_v25 = vld [vmem:[#allocation2 + $0x30] sm:$0xff]  ;;  %v484_v26 = vld [vmem:[#allocation2 + $0x48] sm:$0xff]  ;;  %v2582_v29 = vpack.c.bf16 %v482_v18, %v478_v17  ;;  %vm541_vm5 = vcmask 687104   ;;  %s3215_s25 = smov 32   ;;  %vm909_vm6 = vcmask 261120  }
  0x55   : > { %s2429_s21 = sshll.u32 %s357_s24, 6  ;;  %v488_v27 = vld [vmem:[#allocation2 + $0x68] sm:$0xff]  ;;  %v486_v30 = vld [vmem:[#allocation2 + $0x58] sm:$0xff]  ;;  %v483_v32 = vld [vmem:[#allocation2 + $0x40] sm:$0xff]  ;;  %2563 = vmatprep.subr.bf16.mxu0 %v2562_v28  ;;  %v2564_v41 = vpack.c.bf16 %v479_v23, %v475_v22  ;;  %v2584_v42 = vpack.c.bf16 %v481_v25, %v477_v24  ;;  %vm1053_vm7 = vcmask 1040384   ;;  %vm3216_vm8 = vmmov 1  }
  0x56   : > { %s3403_s29 = scalar_lea.vmem %s4258_s0, %s2429_s21  ;;  %v490_v31 = vld [vmem:[#allocation2 + $0x78] sm:$0xff]  ;;  %v487_v35 = vld [vmem:[#allocation2 + $0x60] sm:$0xff]  ;;  %v485_v36 = vld [vmem:[#allocation2 + $0x50] sm:$0xff]  ;;  %2583 = vmatprep.subr.bf16.mxu1 %v2582_v29  ;;  %v2566_v44 = vpack.c.bf16 %v488_v27, %v484_v26  ;;  %vm1040_vm10 = vcmask 465920   ;;  %s3217_s28 = smov 96   ;;  %vm1187_vm11 = vcmask 785408  }
  0x57   : > { %v3406_v1 = vld [vmem:[%s3403_s29] sm:$0xff]  ;;  %v3409_v2 = vld [vmem:[%s3403_s29 + $0x8] sm:$0xff]  ;;  %v3412_v3 = vld [vmem:[%s3403_s29 + $0x10] sm:$0xff]  ;;  %v2586_v45 = vpack.c.bf16 %v490_v31, %v486_v30  ;;  %2565 = vmatpush1.bf16.msra.mxu0 %v2564_v41  ;;  %2585 = vmatpush1.bf16.msra.mxu1 %v2584_v42  ;;  %v2568_v49 = vpack.c.bf16 %v487_v35, %v483_v32  ;;  %vm1234_vm12 = vcmask 523264   ;;  %s3219_s17 = smov 16   ;;  %vm1776_vm13 = vcmask 236544  }
  0x58   : > { %v378_v4 = vrot.slane %v3406_v1, 1  ;;  %v379_v5 = vrot.slane %v3409_v2, 1  ;;  %v381_v6 = vrot.slane %v3412_v3, 1  ;;  %v418_v7 = vrot.slane %v3406_v1, 2  ;;  %v3419_v8 = vld [vmem:[%s3403_s29 + $0x18] sm:$0xff]  ;;  %v3426_v13 = vld [vmem:[%s3403_s29 + $0x20] sm:$0xff]  ;;  %2567 = vmatprep.subr.bf16.mxu0 %v2566_v44  ;;  %vm2615_vm9 = vmpackc.low %vm1053_vm7, %vm3216_vm8 }
  0x59   : > { %v419_v9 = vrot.slane %v3409_v2, 2  ;;  %v421_v10 = vrot.slane %v3412_v3, 2  ;;  %v383_v15 = vrot.slane %v3419_v8, 1  ;;  %v423_v21 = vrot.slane %v3419_v8, 2  ;;  %v489_v37 = vld [vmem:[#allocation2 + $0x70] sm:$0xff]  ;;  %v3441_v40 = vld [vmem:[%s3403_s29 + $0x28] sm:$0xff]  ;;  %2587 = vmatprep.subr.bf16.mxu1 %v2586_v45 }
  0x5a   : > { %v380_v11 = vsel %vm377_vm0, %v378_v4, %v379_v5  ;;  %v382_v12 = vsel %vm377_vm0, %v379_v5, %v381_v6  ;;  %v385_v34 = vrot.slane %v3426_v13, 1  ;;  %v425_v39 = vrot.slane %v3426_v13, 2  ;;  %v492_v43 = vld [vmem:[#allocation2 + $0x88] sm:$0xff]  ;;  %v494_v47 = vld [vmem:[#allocation2 + $0x98] sm:$0xff]  ;;  %v491_v51 = vld [vmem:[#allocation2 + $0x80] sm:$0xff]  ;;  %s3220_s22 = smov 112  }
  0x5b   : > { %393 = vrot.lane.b32.xlu0 %v380_v11, %s3213_s14  ;;  %395 = vrot.lane.b32.xlu1 %v382_v12, %s3213_s14  ;;  %v420_v19 = vsel %vm417_vm1, %v418_v7, %v419_v9  ;;  %v422_v20 = vsel %vm417_vm1, %v419_v9, %v421_v10  ;;  %v384_v33 = vsel %vm377_vm0, %v381_v6, %v383_v15  ;;  %v496_v46 = vld [vmem:[#allocation2 + $0xa8] sm:$0xff]  ;;  %v498_v48 = vld [vmem:[#allocation2 + $0xb8] sm:$0xff]  ;;  %v387_v53 = vrot.slane %v3441_v40, 1  ;;  %v495_v54 = vld [vmem:[#allocation2 + $0xa0] sm:$0xff]  ;;  %s3221_s23 = smov 80   ;;  %s3222_s11 = smov 48  }
  0x5c   : > { %v424_v38 = vsel %vm417_vm1, %v421_v10, %v423_v21  ;;  %v2588_v50 = vpack.c.bf16 %v489_v37, %v485_v36  ;;  %v386_v52 = vsel %vm377_vm0, %v383_v15, %v385_v34  ;;  %v493_v55 = vld [vmem:[#allocation2 + $0x90] sm:$0xff]  ;;  %v426_v57 = vsel %vm417_vm1, %v423_v21, %v425_v39  ;;  %v3450_v59 = vld [vmem:[%s3403_s29 + $0x30] sm:$0xff]  ;;  %v500_v62 = vld [vmem:[#allocation2 + $0xc8] sm:$0xff]  ;;  %2569 = vmatpush1.bf16.msra.mxu0 %v2568_v49  ;;  %p4286_p1 = scmp.ne.s32.totalorder %s4277_s19, 0 }
  0x5d   : > { %v497_v56 = vld [vmem:[#allocation2 + $0xb0] sm:$0xff]  ;;  %v427_v58 = vrot.slane %v3441_v40, 2  ;;  %v2570_v60 = vpack.c.bf16 %v496_v46, %v492_v43  ;;  %v2590_v61 = vpack.c.bf16 %v498_v48, %v494_v47  ;;  %v504_v63 = vld [vmem:[#allocation2 + $0xe8] sm:$0xff]  ;;  %v502_v4 = vld [vmem:[#allocation2 + $0xd8] sm:$0xff]  ;;  %v2572_v6 = vpack.c.bf16 %v495_v54, %v491_v51 }
  0x5e   : > { %v506_v5 = vld [vmem:[#allocation2 + $0xf8] sm:$0xff]  ;;  %2589 = vmatpush1.bf16.msra.mxu1 %v2588_v50  ;;  %v2592_v7 = vpack.c.bf16 %v497_v56, %v493_v55  ;;  %v499_v9 = vld [vmem:[#allocation2 + $0xc0] sm:$0xff]  ;;  %v388_v10 = vsel %vm377_vm0, %v385_v34, %v387_v53  ;;  %v389_v11 = vrot.slane %v3450_v59, 1  ;;  %v501_v14 = vld [vmem:[#allocation2 + $0xd0] sm:$0xff]  ;;  %v429_v17 = vrot.slane %v3450_v59, 2 }
  0x5f   : > { %433 = vrot.lane.b32.xlu0 %v420_v19, %s3214_s16  ;;  %435 = vrot.lane.b32.xlu1 %v422_v20, %s3214_s16  ;;  %v503_v12 = vld [vmem:[#allocation2 + $0xe0] sm:$0xff]  ;;  %v505_v15 = vld [vmem:[#allocation2 + $0xf0] sm:$0xff]  ;;  %v428_v16 = vsel %vm417_vm1, %v425_v39, %v427_v58  ;;  %v3459_v18 = vld [vmem:[%s3403_s29 + $0x38] sm:$0xf]  ;;  %v2574_v19 = vpack.c.bf16 %v504_v63, %v500_v62  ;;  %v2594_v20 = vpack.c.bf16 %v506_v5, %v502_v4  ;;  %s3218_s29 = smov 64   ;;  %vm1742_vm14 = vcmask 130048  }
  0x60   : > { %2571 = vmatprep.subr.bf16.mxu0 %v2570_v60  ;;  %2591 = vmatprep.subr.bf16.mxu1 %v2590_v61  ;;  %v508_v21 = vld [vmem:[#allocation2 + $0x108] sm:$0xff]  ;;  %v510_v23 = vld [vmem:[#allocation2 + $0x118] sm:$0xff]  ;;  %v2576_v25 = vpack.c.bf16 %v503_v12, %v499_v9  ;;  %v2596_v26 = vpack.c.bf16 %v505_v15, %v501_v14  ;;  %v507_v27 = vld [vmem:[#allocation2 + $0x100] sm:$0xff]  ;;  %v390_v28 = vsel %vm377_vm0, %v387_v53, %v389_v11  ;;  %v391_v29 = vrot.slane %v3459_v18, 1 }
  0x61   : > { %v512_v22 = vld [vmem:[#allocation2 + $0x128] sm:$0xff]  ;;  %v514_v24 = vld [vmem:[#allocation2 + $0x138] sm:$0xff]  ;;  %2573 = vmatpush1.bf16.msra.mxu0 %v2572_v6  ;;  %v511_v30 = vld [vmem:[#allocation2 + $0x120] sm:$0xff]  ;;  %v431_v34 = vrot.slane %v3459_v18, 2  ;;  %v521_v14 = vlaneseq  ;;  %vm1783_vm15 = vcmask 1044480  }
  0x62   : > { %2593 = vmatpush1.bf16.msra.mxu1 %v2592_v7  ;;  %v509_v31 = vld [vmem:[#allocation2 + $0x110] sm:$0xff]  ;;  %2575 = vmatprep.subr.bf16.mxu0 %v2574_v19  ;;  %v2578_v35 = vpack.c.bf16 %v512_v22, %v508_v21  ;;  %v2598_v36 = vpack.c.bf16 %v514_v24, %v510_v23  ;;  %v2580_v37 = vpack.c.bf16 %v511_v30, %v507_v27  ;;  %v516_v42 = vld [vmem:[#allocation2 + $0x148] sm:$0xf]  ;;  %v518_v43 = vld [vmem:[#allocation2 + $0x158] sm:$0xf] }
  0x63   : > { %397 = vrot.lane.b32.xlu0 %v384_v33, %s3213_s14  ;;  %437 = vrot.lane.b32.xlu1 %v424_v38, %s3214_s16  ;;  %v513_v32 = vld [vmem:[#allocation2 + $0x130] sm:$0xff]  ;;  %v430_v33 = vsel %vm417_vm1, %v427_v58, %v429_v17  ;;  %v392_v39 = vsel %vm377_vm0, %v389_v11, %v391_v29  ;;  %v432_v41 = vsel %vm417_vm1, %v429_v17, %v431_v34  ;;  %v515_v44 = vld [vmem:[#allocation2 + $0x140] sm:$0xf]  ;;  %v3530_v15 = vshrl.u32 %v521_v14, 7 }
  0x64   : > { %2595 = vmatprep.subr.bf16.mxu1 %v2594_v20  ;;  %v2600_v38 = vpack.c.bf16 %v513_v32, %v509_v31  ;;  %v517_v45 = vld [vmem:[#allocation2 + $0x150] sm:$0xf] }
  0x65   : > { %2577 = vmatpush1.bf16.msra.mxu0 %v2576_v25  ;;  %v3536_v17 = vld [vmem:[%s4260_s2] sm:$0xf]  ;;  %v527_v23 = vsub.s32 1, %v3530_v15 }
  0x66   : > { %2597 = vmatpush1.bf16.msra.mxu1 %v2596_v26  ;;  %2579 = vmatprep.subr.bf16.mxu0 %v2578_v35 }
  0x67   : > { %399 = vrot.lane.b32.xlu0 %v386_v52, %s3213_s14  ;;  %439 = vrot.lane.b32.xlu1 %v426_v57, %s3214_s16 }
  0x68   : > { %2599 = vmatprep.subr.bf16.mxu1 %v2598_v36 }
  0x69   : > { %2581 = vmatpush1.bf16.msra.mxu0 %v2580_v37 }
  0x6a   : > { %2601 = vmatpush1.bf16.msra.mxu1 %v2600_v38  ;;  %2390 = vmatprep.subr.msk.mxu0 %vm566_vm2, %v516_v42 }
  0x6b   : > { %401 = vrot.lane.b32.xlu0 %v388_v10, %s3213_s14  ;;  %441 = vrot.lane.b32.xlu1 %v428_v16, %s3214_s16  ;;  %v531_v16 = vsub.s32 2, %v3530_v15 }
  0x6c   : > { %2400 = vmatprep.subr.msk.mxu1 %vm566_vm2, %v518_v43 }
  0x6d   : > { %2391 = vmatpush1.msk.msra.mxu0 %vm566_vm2, %v515_v44  ;;  %v3540_v19 = vrot.slane %v3536_v17, %v531_v16 }
  0x6e   : > { %2401 = vmatpush1.msk.msra.mxu1 %vm566_vm2, %v517_v45  ;;  %vm1890_vm2 = vcmask 654336  }
  0x6f   : > { %403 = vrot.lane.b32.xlu0 %v390_v28, %s3213_s14  ;;  %443 = vrot.lane.b32.xlu1 %v430_v33, %s3214_s16 }
  0x73   : > { %405 = vrot.lane.b32.xlu0 %v392_v39, %s3213_s14  ;;  %445 = vrot.lane.b32.xlu1 %v432_v41, %s3214_s16 }
  0x77   : > { %407 = vrot.lane.b32.xlu0 %v391_v29, %s3213_s14  ;;  %447 = vrot.lane.b32.xlu1 %v431_v34, %s3214_s16  ;;  %v3553_v29 = vrot.slane %v3536_v17, %v527_v23  ;;  %s353_s16 = sand.u32 1, %s3196_s10  }
  0x78   : > { %s2285_s24 = scalar_lea.sflag [#allocation4], %s353_s16 }
  0xcd   : > { %v394_v46 = vpop.permute.xlu0 %393  ;;  %v396_v47 = vpop.permute.xlu1 %395 }
  0xce   : > { %v458_v48 = vsel %vm457_vm3, %v3406_v1, %v394_v46  ;;  %v459_v52 = vsel %vm457_vm3, %v3409_v2, %v396_v47 }
  0xd1   : > { %v434_v49 = vpop.permute.xlu0 %433  ;;  %v436_v50 = vpop.permute.xlu1 %435 }
  0xd2   : > { %v467_v51 = vsel %vm466_vm4, %v458_v48, %v434_v49  ;;  %v468_v55 = vsel %vm466_vm4, %v459_v52, %v436_v50 }
  0xd3   : > { %2392 = vmatmul.mubr.msk.f32.vlgmr.msra.gmra.mrb[0].mxu0 %vm541_vm5, %v467_v51  ;;  %2402 = vmatmul.mubr.msk.f32.vlgmr.msra.gmra.mrb[0].mxu1 %vm541_vm5, %v467_v51 }
  0xd4   : > { %649 = vmatprep.mubr.f32.mxu0 %v3212_v0  ;;  %762 = vmatprep.mubr.f32.mxu1 %v3212_v0 }
  0xd5   : > { %v398_v53 = vpop.permute.xlu0 %397  ;;  %v438_v54 = vpop.permute.xlu1 %437 }
  0xd6   : > { %v460_v1 = vsel %vm457_vm3, %v3412_v3, %v398_v53 }
  0xd7   : > { %2393 = vmatmul.mubr.msk.f32.gmra.mrb[2].mxu0 %vm541_vm5, %v468_v55  ;;  %2403 = vmatmul.mubr.msk.f32.gmra.mrb[2].mxu1 %vm541_vm5, %v468_v55  ;;  %v469_v2 = vsel %vm466_vm4, %v460_v1, %v438_v54 }
  0xd8   : > { %655 = vmatprep.mubr.f32.mxu0 %v3212_v0  ;;  %768 = vmatprep.mubr.f32.mxu1 %v3212_v0 }
  0xd9   : > { %v400_v56 = vpop.permute.xlu0 %399  ;;  %v440_v57 = vpop.permute.xlu1 %439 }
  0xda   : > { %v461_v58 = vsel %vm457_vm3, %v3419_v8, %v400_v56 }
  0xdb   : > { %2394 = vmatmul.mubr.msk.f32.gmra.mrb[4].mxu0 %vm541_vm5, %v469_v2  ;;  %2404 = vmatmul.mubr.msk.f32.gmra.mrb[4].mxu1 %vm541_vm5, %v469_v2  ;;  %v470_v3 = vsel %vm466_vm4, %v461_v58, %v440_v57 }
  0xdc   : > { %661 = vmatprep.mubr.f32.mxu0 %v3212_v0  ;;  %774 = vmatprep.mubr.f32.mxu1 %v3212_v0 }
  0xdd   : > { %v402_v60 = vpop.permute.xlu0 %401  ;;  %v442_v61 = vpop.permute.xlu1 %441 }
  0xde   : > { %v462_v62 = vsel %vm457_vm3, %v3426_v13, %v402_v60 }
  0xdf   : > { %2395 = vmatmul.mubr.msk.f32.gmra.mrb[6].mxu0 %vm541_vm5, %v470_v3  ;;  %2405 = vmatmul.mubr.msk.f32.gmra.mrb[6].mxu1 %vm541_vm5, %v470_v3  ;;  %v471_v8 = vsel %vm466_vm4, %v462_v62, %v442_v61 }
  0xe0   : > { %667 = vmatprep.mubr.f32.mxu0 %v3212_v0  ;;  %780 = vmatprep.mubr.f32.mxu1 %v3212_v0 }
  0xe1   : > { %v404_v63 = vpop.permute.xlu0 %403  ;;  %v444_v4 = vpop.permute.xlu1 %443 }
  0xe2   : > { %v463_v5 = vsel %vm457_vm3, %v3441_v40, %v404_v63 }
  0xe3   : > { %2396 = vmatmul.mubr.msk.f32.gmra.mrb[8].mxu0 %vm541_vm5, %v471_v8  ;;  %2406 = vmatmul.mubr.msk.f32.gmra.mrb[8].mxu1 %vm541_vm5, %v471_v8  ;;  %v472_v13 = vsel %vm466_vm4, %v463_v5, %v444_v4 }
  0xe4   : > { %673 = vmatprep.mubr.f32.mxu0 %v3212_v0  ;;  %786 = vmatprep.mubr.f32.mxu1 %v3212_v0 }
  0xe5   : > { %v406_v6 = vpop.permute.xlu0 %405  ;;  %v446_v7 = vpop.permute.xlu1 %445 }
  0xe6   : > { %v464_v9 = vsel %vm457_vm3, %v3450_v59, %v406_v6 }
  0xe7   : > { %2397 = vmatmul.mubr.msk.f32.gmra.mrb[10].mxu0 %vm541_vm5, %v472_v13  ;;  %2407 = vmatmul.mubr.msk.f32.gmra.mrb[10].mxu1 %vm541_vm5, %v472_v13  ;;  %v473_v40 = vsel %vm466_vm4, %v464_v9, %v446_v7 }
  0xe8   : > { %679 = vmatprep.mubr.f32.mxu0 %v3212_v0  ;;  %792 = vmatprep.mubr.f32.mxu1 %v3212_v0 }
  0xe9   : > { %v408_v10 = vpop.permute.xlu0 %407  ;;  %v448_v11 = vpop.permute.xlu1 %447 }
  0xea   : > { %v465_v12 = vsel %vm457_vm3, %v3459_v18, %v408_v10  ;;  %v535_v18 = vsub.s32 3, %v3530_v15  ;;  %vm1893_vm3 = vcmask 392192  }
  0xeb   : > { %2398 = vmatmul.mubr.msk.f32.gmra.mrb[12].mxu0 %vm541_vm5, %v473_v40  ;;  %2408 = vmatmul.mubr.msk.f32.gmra.mrb[12].mxu1 %vm541_vm5, %v473_v40  ;;  %v474_v59 = vsel %vm466_vm4, %v465_v12, %v448_v11  ;;  %vm3224_vm4 = vmmov 0  }
  0xec   : > { %685 = vmatprep.mubr.f32.mxu0 %v3212_v0  ;;  %798 = vmatprep.mubr.f32.mxu1 %v3212_v0  ;;  %v3543_v20 = vrot.slane %v3536_v17, %v535_v18 }
  0xef   : > { %2399 = vmatmul.mubr.msk.f32.gmra.mrb[14].mxu0 %vm541_vm5, %v474_v59  ;;  %2409 = vmatmul.mubr.msk.f32.gmra.mrb[14].mxu1 %vm541_vm5, %v474_v59 }
  0xf0   : > { %1124 = vmatprep.mubr.f32.mxu0 %v3212_v0 }
 0x1a6   : > { %v3545_v21 = vpop.f32.mrb[0].mxu0  ;;  %v758_v22 = vpop.f32.mrb[0].mxu1 }
 0x1a7   : > { %v759_v24 = vadd.f32 %v758_v22, %v3540_v19  ;;  %v647_v25 = vpop.f32.mrb[1].mxu0  ;;  %v760_v26 = vpop.f32.mrb[1].mxu1 }
 0x1a8   : > { %v761_v27 = vadd.f32 %v760_v26, %v3543_v20  ;;  %v3563_v41 = vadd.f32 %v647_v25, %v3553_v29 }
 0x1a9   : > { %v807_v28 = vmax.f32 %v759_v24, 0.0 }
 0x1aa   : > { %v808_v30 = vmax.f32 %v761_v27, 0.0  ;;  %v3555_v31 = vpop.f32.mrb[2].mxu0  ;;  %v764_v32 = vpop.f32.mrb[2].mxu1  ;;  %v806_v53 = vmax.f32 %v3563_v41, 0.0 }
 0x1ab   : > { %v765_v33 = vadd.f32 %v764_v32, %v3540_v19  ;;  %v653_v34 = vpop.f32.mrb[3].mxu0  ;;  %v766_v35 = vpop.f32.mrb[3].mxu1 }
 0x1ac   : > { %v2998_v36 = vpack.i.bf16 %v808_v30, %v807_v28  ;;  %v3559_v37 = vadd.f32 %v653_v34, %v3553_v29  ;;  %v767_v38 = vadd.f32 %v766_v35, %v3543_v20 }
 0x1ad   : > { %v811_v39 = vmax.f32 %v765_v33, 0.0 }
 0x1ae   : > { %v812_v42 = vmax.f32 %v767_v38, 0.0  ;;  %2999 = vrot.lane.b32.xlu0 %v2998_v36, %s3215_s25  ;;  %v3566_v43 = vpop.f32.mrb[4].mxu0  ;;  %v770_v44 = vpop.f32.mrb[4].mxu1  ;;  %v810_v48 = vmax.f32 %v3559_v37, 0.0 }
 0x1af   : > { %v771_v45 = vadd.f32 %v770_v44, %v3540_v19  ;;  %v659_v46 = vpop.f32.mrb[5].mxu0  ;;  %v772_v47 = vpop.f32.mrb[5].mxu1 }
 0x1b0   : > { %v3003_v49 = vpack.i.bf16 %v812_v42, %v811_v39  ;;  %v773_v50 = vadd.f32 %v772_v47, %v3543_v20  ;;  %v3572_v52 = vadd.f32 %v659_v46, %v3553_v29  ;;  %v3008_v58 = vpack.i.bf16 %v810_v48, %v806_v53 }
 0x1b1   : > { %v815_v51 = vmax.f32 %v771_v45, 0.0 }
 0x1b2   : > { %v816_v54 = vmax.f32 %v773_v50, 0.0  ;;  %3004 = vrot.lane.b32.xlu1 %v3003_v49, %s3215_s25  ;;  %v3576_v55 = vpop.f32.mrb[6].mxu0  ;;  %v776_v1 = vpop.f32.mrb[6].mxu1  ;;  %v814_v60 = vmax.f32 %v3572_v52, 0.0 }
 0x1b3   : > { %v777_v2 = vadd.f32 %v776_v1, %v3540_v19  ;;  %v665_v56 = vpop.f32.mrb[7].mxu0  ;;  %v778_v57 = vpop.f32.mrb[7].mxu1 }
 0x1b4   : > { %v3013_v3 = vpack.i.bf16 %v816_v54, %v815_v51  ;;  %v779_v62 = vadd.f32 %v778_v57, %v3543_v20  ;;  %v3586_v8 = vadd.f32 %v665_v56, %v3553_v29 }
 0x1b5   : > { %v819_v61 = vmax.f32 %v777_v2, 0.0 }
 0x1b6   : > { %3009 = vrot.lane.b32.xlu1 %v3008_v58, %s3215_s25  ;;  %3014 = vrot.lane.b32.xlu0 %v3013_v3, %s3215_s25  ;;  %v3590_v63 = vpop.f32.mrb[8].mxu0  ;;  %v782_v4 = vpop.f32.mrb[8].mxu1  ;;  %v820_v40 = vmax.f32 %v779_v62, 0.0  ;;  %v818_v12 = vmax.f32 %v3586_v8, 0.0 }
 0x1b7   : > { %v3018_v5 = vpack.i.bf16 %v819_v61, %v814_v60  ;;  %v783_v13 = vadd.f32 %v782_v4, %v3540_v19  ;;  %v671_v6 = vpop.f32.mrb[9].mxu0  ;;  %v784_v7 = vpop.f32.mrb[9].mxu1 }
 0x1b8   : > { %v785_v9 = vadd.f32 %v784_v7, %v3543_v20  ;;  %v3597_v11 = vadd.f32 %v671_v6, %v3553_v29 }
 0x1b9   : > { %v823_v10 = vmax.f32 %v783_v13, 0.0 }
 0x1ba   : > { %v824_v59 = vmax.f32 %v785_v9, 0.0  ;;  %3019 = vrot.lane.b32.xlu0 %v3018_v5, %s3215_s25  ;;  %v3601_v14 = vpop.f32.mrb[10].mxu0  ;;  %v788_v16 = vpop.f32.mrb[10].mxu1  ;;  %v822_v27 = vmax.f32 %v3597_v11, 0.0 }
 0x1bb   : > { %v3023_v18 = vpack.i.bf16 %v823_v10, %v820_v40  ;;  %v789_v22 = vadd.f32 %v788_v16, %v3540_v19  ;;  %v677_v24 = vpop.f32.mrb[11].mxu0  ;;  %v790_v25 = vpop.f32.mrb[11].mxu1 }
 0x1bc   : > { %v3028_v26 = vpack.i.bf16 %v818_v12, %v824_v59  ;;  %v791_v30 = vadd.f32 %v790_v25, %v3543_v20  ;;  %v3610_v32 = vadd.f32 %v677_v24, %v3553_v29 }
 0x1bd   : > { %v827_v28 = vmax.f32 %v789_v22, 0.0  ;;  %3024 = vrot.lane.b32.xlu1 %v3023_v18, %s3215_s25 }
 0x1be   : > { %3029 = vrot.lane.b32.xlu0 %v3028_v26, %s3215_s25  ;;  %v3613_v33 = vpop.f32.mrb[12].mxu0  ;;  %v794_v34 = vpop.f32.mrb[12].mxu1  ;;  %v828_v44 = vmax.f32 %v791_v30, 0.0  ;;  %v826_v47 = vmax.f32 %v3610_v32, 0.0 }
 0x1bf   : > { %v3033_v35 = vpack.i.bf16 %v827_v28, %v822_v27  ;;  %v795_v36 = vadd.f32 %v794_v34, %v3540_v19  ;;  %v683_v38 = vpop.f32.mrb[13].mxu0  ;;  %v796_v39 = vpop.f32.mrb[13].mxu1 }
 0x1c0   : > { %v797_v42 = vadd.f32 %v796_v39, %v3543_v20  ;;  %v3620_v46 = vadd.f32 %v683_v38, %v3553_v29 }
 0x1c1   : > { %v831_v45 = vmax.f32 %v795_v36, 0.0  ;;  %3034 = vrot.lane.b32.xlu1 %v3033_v35, %s3215_s25 }
 0x1c2   : > { %v832_v49 = vmax.f32 %v797_v42, 0.0  ;;  %v3624_v50 = vpop.f32.mrb[14].mxu0  ;;  %v800_v51 = vpop.f32.mrb[14].mxu1  ;;  %v830_v61 = vmax.f32 %v3620_v46, 0.0 }
 0x1c3   : > { %v3038_v54 = vpack.i.bf16 %v831_v45, %v828_v44  ;;  %v801_v1 = vadd.f32 %v800_v51, %v3540_v19  ;;  %v689_v2 = vpop.f32.mrb[15].mxu0  ;;  %v802_v56 = vpop.f32.mrb[15].mxu1 }
 0x1c4   : > { %v3043_v57 = vpack.i.bf16 %v826_v47, %v832_v49  ;;  %v3630_v58 = vadd.f32 %v689_v2, %v3553_v29  ;;  %v803_v3 = vadd.f32 %v802_v56, %v3543_v20  ;;  %v523_v20 = vsub.s32 0, %v3530_v15 }
 0x1c5   : > { %v835_v62 = vmax.f32 %v801_v1, 0.0  ;;  %3039 = vrot.lane.b32.xlu0 %v3038_v54, %s3215_s25 }
 0x1c6   : > { %v834_v4 = vmax.f32 %v3630_v58, 0.0  ;;  %v836_v5 = vmax.f32 %v803_v3, 0.0  ;;  %3044 = vrot.lane.b32.xlu1 %v3043_v57, %s3215_s25  ;;  %v3647_v9 = vrot.slane %v3536_v17, %v523_v20 }
 0x1c7   : > { %v3048_v19 = vpack.i.bf16 %v835_v62, %v830_v61 }
 0x1c8   : > { %v3053_v13 = vpack.i.bf16 %v834_v4, %v836_v5  ;;  %v646_v18 = vadd.f32 %v3545_v21, %v3647_v9  ;;  %v652_v22 = vadd.f32 %v3555_v31, %v3647_v9  ;;  %v658_v25 = vadd.f32 %v3566_v43, %v3647_v9 }
 0x1c9   : > { %3049 = vrot.lane.b32.xlu0 %v3048_v19, %s3215_s25  ;;  %v664_v17 = vadd.f32 %v3576_v55, %v3647_v9  ;;  %v670_v43 = vadd.f32 %v3590_v63, %v3647_v9  ;;  %v676_v3 = vadd.f32 %v3601_v14, %v3647_v9  ;;  %v682_v14 = vadd.f32 %v3613_v33, %v3647_v9 }
 0x1ca   : > { %3054 = vrot.lane.b32.xlu1 %v3053_v13, %s3215_s25  ;;  %v805_v38 = vmax.f32 %v646_v18, 0.0  ;;  %v809_v39 = vmax.f32 %v652_v22, 0.0  ;;  %v813_v49 = vmax.f32 %v658_v25, 0.0 }
 0x1cb   : > { %v817_v51 = vmax.f32 %v664_v17, 0.0  ;;  %v821_v2 = vmax.f32 %v670_v43, 0.0 }
 0x220   : > { %v3000_v29 = vpop.permute.xlu0 %2999 }
 0x221   : > { %v3002_v6 = vunpack.i.h.bf16 %v3000_v29  ;;  %v3001_v7 = vunpack.i.l.bf16 %v3000_v29 }
 0x223   : > { %v911_v10 = vsel %vm909_vm6, %v3001_v7, %v3002_v6 }
 0x224   : > { %v3005_v40 = vpop.permute.xlu1 %3004  ;;  %v943_v26 = vmax.f32 %v806_v53, %v911_v10 }
 0x225   : > { %v3007_v59 = vunpack.i.h.bf16 %v3005_v40  ;;  %v3006_v16 = vunpack.i.l.bf16 %v3005_v40 }
 0x226   : > { %v977_v54 = vrot.slane %v943_v26, 1 }
 0x227   : > { %v913_v24 = vsel %vm909_vm6, %v3006_v16, %v3007_v59 }
 0x228   : > { %v945_v28 = vmax.f32 %v810_v48, %v913_v24  ;;  %v3010_v30 = vpop.permute.xlu1 %3009  ;;  %v3015_v34 = vpop.permute.xlu0 %3014 }
 0x229   : > { %v3012_v21 = vunpack.i.h.bf16 %v3010_v30  ;;  %v3011_v35 = vunpack.i.l.bf16 %v3010_v30  ;;  %v3017_v36 = vunpack.i.h.bf16 %v3015_v34  ;;  %v3016_v31 = vunpack.i.l.bf16 %v3015_v34 }
 0x22a   : > { %v978_v42 = vrot.slane %v945_v28, 1 }
 0x22b   : > { %v912_v55 = vsel %vm909_vm6, %v3012_v21, %v3006_v16  ;;  %v910_v41 = vsel %vm909_vm6, %v3011_v35, %v3001_v7  ;;  %v915_v53 = vsel %vm909_vm6, %v3016_v31, %v3017_v36  ;;  %v825_v35 = vmax.f32 %v676_v3, 0.0 }
 0x22c   : > { %v944_v37 = vmax.f32 %v809_v39, %v912_v55  ;;  %v942_v48 = vmax.f32 %v805_v38, %v910_v41  ;;  %v3670_v44 = vmax.f32 %v814_v60, %v915_v53  ;;  %v3020_v45 = vpop.permute.xlu0 %3019  ;;  %v979_v52 = vsel %vm377_vm0, %v977_v54, %v978_v42 }
 0x22d   : > { %v3021_v1 = vunpack.i.l.bf16 %v3020_v45  ;;  %v3022_v62 = vunpack.i.h.bf16 %v3020_v45  ;;  %v1021_v21 = vmax.f32 %v943_v26, %v979_v52  ;;  %v688_v38 = vadd.f32 %v3624_v50, %v3647_v9 }
 0x22e   : > { %v975_v63 = vrot.slane %v944_v37, 1  ;;  %v974_v56 = vrot.slane %v942_v48, 1  ;;  %v982_v57 = vrot.slane %v3670_v44, 1  ;;  %v829_v55 = vmax.f32 %v682_v14, 0.0 }
 0x22f   : > { %v914_v5 = vsel %vm909_vm6, %v3021_v1, %v3016_v31  ;;  %v3025_v19 = vpop.permute.xlu1 %3024 }
 0x230   : > { %v976_v60 = vsel %vm377_vm0, %v974_v56, %v975_v63  ;;  %v3678_v13 = vmax.f32 %v813_v49, %v914_v5  ;;  %v3027_v29 = vunpack.i.h.bf16 %v3025_v19  ;;  %v3026_v6 = vunpack.i.l.bf16 %v3025_v19  ;;  %v3030_v7 = vpop.permute.xlu0 %3029 }
 0x231   : > { %v1020_v40 = vmax.f32 %v942_v48, %v976_v60  ;;  %v3032_v10 = vunpack.i.h.bf16 %v3030_v7  ;;  %v3031_v59 = vunpack.i.l.bf16 %v3030_v7  ;;  %v983_v16 = vsel %vm377_vm0, %v978_v42, %v982_v57 }
 0x232   : > { %v980_v18 = vrot.slane %v3678_v13, 1  ;;  %v917_v22 = vsel %vm909_vm6, %v3022_v62, %v3026_v6  ;;  %v1023_v24 = vmax.f32 %v945_v28, %v983_v16 }
 0x233   : > { %v949_v25 = vmax.f32 %v818_v12, %v917_v22  ;;  %v916_v17 = vsel %vm909_vm6, %v3032_v10, %v3022_v62  ;;  %v919_v30 = vsel %vm909_vm6, %v3027_v29, %v3031_v59  ;;  %v3035_v34 = vpop.permute.xlu1 %3034 }
 0x234   : > { %v948_v36 = vmax.f32 %v817_v51, %v916_v17  ;;  %v3691_v31 = vmax.f32 %v822_v27, %v919_v30  ;;  %v3036_v33 = vunpack.i.l.bf16 %v3035_v34  ;;  %v2602_v39 = vpack.c.bf16 %v1023_v24, %v1021_v21 }
 0x235   : > { %v986_v28 = vrot.slane %v949_v25, 1  ;;  %v981_v8 = vsel %vm377_vm0, %v975_v63, %v980_v18  ;;  %v3037_v41 = vunpack.i.h.bf16 %v3035_v34  ;;  %v833_v63 = vmax.f32 %v688_v38, 0.0 }
 0x236   : > { %v984_v12 = vrot.slane %v948_v36, 1  ;;  %v990_v43 = vrot.slane %v3691_v31, 1  ;;  %v918_v42 = vsel %vm909_vm6, %v3036_v33, %v3027_v29  ;;  %v1022_v26 = vmax.f32 %v944_v37, %v981_v8  ;;  %2603 = vmatprep.subr.bf16.mxu0 %v2602_v39 }
 0x237   : > { %v3698_v53 = vmax.f32 %v821_v2, %v918_v42  ;;  %v3040_v11 = vpop.permute.xlu0 %3039  ;;  %v987_v27 = vsel %vm377_vm0, %v982_v57, %v986_v28 }
 0x238   : > { %v3042_v48 = vunpack.i.h.bf16 %v3040_v11  ;;  %v3041_v50 = vunpack.i.l.bf16 %v3040_v11  ;;  %v3045_v9 = vpop.permute.xlu1 %3044  ;;  %v2604_v45 = vpack.c.bf16 %v1022_v26, %v1020_v40  ;;  %v991_v49 = vsel %vm377_vm0, %v986_v28, %v990_v43 }
 0x239   : > { %v988_v51 = vrot.slane %v3698_v53, 1  ;;  %v3047_v54 = vunpack.i.h.bf16 %v3045_v9  ;;  %v3046_v1 = vunpack.i.l.bf16 %v3045_v9  ;;  %v1025_v37 = vmax.f32 %v3670_v44, %v987_v27  ;;  %v1039_v9 = vld [vmem:[%s4261_s3 + $0x18] sm:$0xff] }
 0x23a   : > { %v921_v2 = vsel %vm909_vm6, %v3037_v41, %v3041_v50  ;;  %2605 = vmatpush1.bf16.msra.mxu0 %v2604_v45  ;;  %v1027_v56 = vmax.f32 %v949_v25, %v991_v49  ;;  %v985_v3 = vsel %vm377_vm0, %v980_v18, %v984_v12  ;;  %v1038_v50 = vld [vmem:[%s4261_s3 + $0x10] sm:$0xff]  ;;  %v1256_v45 = vld [vmem:[#allocation5 + $0x8] sm:$0xff]  ;;  %v1258_v49 = vld [vmem:[#allocation5 + $0x18] sm:$0xff] }
 0x23b   : > { %v953_v57 = vmax.f32 %v826_v47, %v921_v2  ;;  %v920_v62 = vsel %vm909_vm6, %v3047_v54, %v3037_v41  ;;  %v923_v5 = vsel %vm909_vm6, %v3042_v48, %v3046_v1  ;;  %v3050_v19 = vpop.permute.xlu0 %3049  ;;  %v989_v52 = vsel %vm377_vm0, %v984_v12, %v988_v51  ;;  %v1257_v1 = vld [vmem:[#allocation5 + $0x10] sm:$0xff]  ;;  %v1262_v2 = vld [vmem:[#allocation5 + $0x38] sm:$0xff] }
 0x23c   : > { %v952_v60 = vmax.f32 %v825_v35, %v920_v62  ;;  %v955_v44 = vmax.f32 %v830_v61, %v923_v5  ;;  %v3052_v29 = vunpack.i.h.bf16 %v3050_v19  ;;  %v3051_v6 = vunpack.i.l.bf16 %v3050_v19  ;;  %v3055_v7 = vpop.permute.xlu1 %3054  ;;  %v1264_v62 = vld [vmem:[#allocation5 + $0x48] sm:$0xff]  ;;  %v1266_v5 = vld [vmem:[#allocation5 + $0x58] sm:$0xff] }
 0x23d   : > { %v994_v40 = vrot.slane %v953_v57, 1  ;;  %v3057_v10 = vunpack.i.h.bf16 %v3055_v7  ;;  %v3056_v59 = vunpack.i.l.bf16 %v3055_v7  ;;  %v2606_v16 = vpack.c.bf16 %v1027_v56, %v1025_v37  ;;  %v1259_v56 = vld [vmem:[#allocation5 + $0x20] sm:$0xff] }
 0x23e   : > { %v992_v32 = vrot.slane %v952_v60, 1  ;;  %v998_v47 = vrot.slane %v955_v44, 1  ;;  %v922_v14 = vsel %vm909_vm6, %v3051_v6, %v3042_v48  ;;  %v1024_v18 = vmax.f32 %v3678_v13, %v985_v3  ;;  %v1037_v48 = vld [vmem:[%s4261_s3 + $0x8] sm:$0xff] }
 0x23f   : > { %v954_v22 = vmax.f32 %v829_v55, %v922_v14  ;;  %v924_v24 = vsel %vm909_vm6, %v3057_v10, %v3052_v29  ;;  %v925_v25 = vsel %vm909_vm6, %v3052_v29, %v3056_v59  ;;  %2607 = vmatprep.subr.bf16.mxu0 %v2606_v16  ;;  %v1026_v46 = vmax.f32 %v948_v36, %v989_v52  ;;  %v1268_v29 = vld [vmem:[#allocation5 + $0x68] sm:$0xff]  ;;  %v1270_v6 = vld [vmem:[#allocation5 + $0x78] sm:$0xff]  ;;  %v1267_v10 = vld [vmem:[#allocation5 + $0x60] sm:$0xff] }
 0x240   : > { %v956_v61 = vmax.f32 %v833_v63, %v924_v24  ;;  %v957_v17 = vmax.f32 %v834_v4, %v925_v25  ;;  %v995_v30 = vsel %vm377_vm0, %v990_v43, %v994_v40  ;;  %v999_v34 = vsel %vm377_vm0, %v994_v40, %v998_v47  ;;  %v1260_v63 = vld [vmem:[#allocation5 + $0x28] sm:$0xff]  ;;  %v1269_v59 = vld [vmem:[#allocation5 + $0x70] sm:$0xff]  ;;  %v1278_v25 = vld [vmem:[#allocation5 + $0xb8] sm:$0xff] }
 0x241   : > { %v996_v21 = vrot.slane %v954_v22, 1  ;;  %v2608_v35 = vpack.c.bf16 %v1026_v46, %v1024_v18  ;;  %v1029_v33 = vmax.f32 %v3691_v31, %v995_v30  ;;  %v1031_v13 = vmax.f32 %v953_v57, %v999_v34  ;;  %v1261_v57 = vld [vmem:[#allocation5 + $0x30] sm:$0xff]  ;;  %v1272_v16 = vld [vmem:[#allocation5 + $0x88] sm:$0xff]  ;;  %v1271_v18 = vld [vmem:[#allocation5 + $0x80] sm:$0xff] }
 0x242   : > { %v1000_v38 = vrot.slane %v956_v61, 1  ;;  %v1002_v28 = vrot.slane %v957_v17, 1  ;;  %v993_v39 = vsel %vm377_vm0, %v988_v51, %v992_v32  ;;  %v1255_v51 = vld [vmem:[#allocation5] sm:$0xff]  ;;  %v2620_v54 = vpack.c.bf16 %v1258_v49, %v1256_v45  ;;  %v1276_v24 = vld [vmem:[#allocation5 + $0xa8] sm:$0xff]  ;;  %v1277_v30 = vld [vmem:[#allocation5 + $0xb0] sm:$0xff] }
 0x243   : > { %2609 = vmatpush1.bf16.msra.mxu0 %v2608_v35  ;;  %v2610_v36 = vpack.c.bf16 %v1031_v13, %v1029_v33  ;;  %v997_v8 = vsel %vm377_vm0, %v992_v32, %v996_v21  ;;  %v1028_v58 = vmax.f32 %v3698_v53, %v993_v39  ;;  %v1036_v53 = vld [vmem:[%s4261_s3] sm:$0xff]  ;;  %v2622_v37 = vpack.c.bf16 %v1257_v1, %v1255_v51  ;;  %v1274_v32 = vld [vmem:[#allocation5 + $0x98] sm:$0xff]  ;;  %v1280_v34 = vld [vmem:[#allocation5 + $0xc8] sm:$0xff] }
 0x244   : > { %v1001_v4 = vsel %vm377_vm0, %v996_v21, %v1000_v38  ;;  %v1034_v12 = vmax.f32 %v956_v61, %v1000_v38  ;;  %v1035_v43 = vmax.f32 %v957_v17, %v1002_v28  ;;  %v1030_v42 = vmax.f32 %v952_v60, %v997_v8  ;;  %2621 = vmatprep.subr.bf16.mxu1 %v2620_v54  ;;  %v1263_v60 = vld [vmem:[#allocation5 + $0x40] sm:$0xff]  ;;  %v1282_v21 = vld [vmem:[#allocation5 + $0xd8] sm:$0xff]  ;;  %v1281_v38 = vld [vmem:[#allocation5 + $0xd0] sm:$0xff] }
 0x245   : > { %v1032_v26 = vmax.f32 %v954_v22, %v1001_v4  ;;  %2611 = vmatprep.subr.bf16.mxu0 %v2610_v36  ;;  %v1003_v31 = vsel %vm377_vm0, %v998_v47, %v1002_v28  ;;  %2623 = vmatpush1.bf16.msra.mxu1 %v2622_v37  ;;  %v2624_v3 = vpack.c.bf16 %v1262_v2, %v1260_v63  ;;  %v1273_v22 = vld [vmem:[#allocation5 + $0x90] sm:$0xff]  ;;  %v1275_v17 = vld [vmem:[#allocation5 + $0xa0] sm:$0xff]  ;;  %v1284_v28 = vld [vmem:[#allocation5 + $0xe8] sm:$0xff] }
 0x246   : > { %v2612_v55 = vpack.c.bf16 %v1030_v42, %v1028_v58  ;;  %v1033_v41 = vmax.f32 %v955_v44, %v1003_v31  ;;  %v2626_v19 = vpack.c.bf16 %v1261_v57, %v1259_v56  ;;  %v2628_v52 = vpack.c.bf16 %v1266_v5, %v1264_v62  ;;  %v1265_v44 = vld [vmem:[#allocation5 + $0x50] sm:$0xff]  ;;  %v1279_v13 = vld [vmem:[#allocation5 + $0xc0] sm:$0xff]  ;;  %v1286_v39 = vld [vmem:[#allocation5 + $0xf8] sm:$0xff] }
 0x247   : > { %v2617_v11 = vpack.c.bf16 %v1034_v12, %v1032_v26  ;;  %2625 = vmatprep.subr.bf16.mxu1 %v2624_v3  ;;  %v2630_v7 = vpack.c.bf16 %v1265_v44, %v1263_v60  ;;  %v2632_v40 = vpack.c.bf16 %v1270_v6, %v1268_v29  ;;  %v2634_v47 = vpack.c.bf16 %v1269_v59, %v1267_v10  ;;  %v1283_v58 = vld [vmem:[#allocation5 + $0xe0] sm:$0xff]  ;;  %v1285_v4 = vld [vmem:[#allocation5 + $0xf0] sm:$0xff]  ;;  %v1288_v12 = vld [vmem:[#allocation5 + $0x108] sm:$0xff] }
 0x248   : > { %2613 = vmatpush1.bf16.msra.mxu0 %v2612_v55  ;;  %v2614_v27 = vpack.c.bf16 %v1035_v43, %v1033_v41  ;;  %v2636_v14 = vpack.c.bf16 %v1274_v32, %v1272_v16  ;;  %v2638_v46 = vpack.c.bf16 %v1273_v22, %v1271_v18  ;;  %v2640_v61 = vpack.c.bf16 %v1278_v25, %v1276_v24  ;;  %v1290_v43 = vld [vmem:[#allocation5 + $0x118] sm:$0xff]  ;;  %v1287_v31 = vld [vmem:[#allocation5 + $0x100] sm:$0xff]  ;;  %v1289_v55 = vld [vmem:[#allocation5 + $0x110] sm:$0xff] }
 0x249   : > { %2627 = vmatpush1.bf16.msra.mxu1 %v2626_v19  ;;  %v2642_v35 = vpack.c.bf16 %v1277_v30, %v1275_v17  ;;  %v2644_v33 = vpack.c.bf16 %v1282_v21, %v1280_v34  ;;  %v2646_v36 = vpack.c.bf16 %v1281_v38, %v1279_v13  ;;  %v2648_v8 = vpack.c.bf16 %v1286_v39, %v1284_v28  ;;  %v1292_v41 = vld [vmem:[#allocation5 + $0x128] sm:$0xff]  ;;  %v1298_v45 = vld [vmem:[#allocation5 + $0x158] sm:$0xff]  ;;  %v1295_v54 = vld [vmem:[#allocation5 + $0x140] sm:$0xff] }
 0x24a   : > { %2616 = vmatprep.subr.msk.bf16.mxu0 %vm2615_vm9, %v2614_v27  ;;  %2629 = vmatprep.subr.bf16.mxu1 %v2628_v52  ;;  %v2650_v42 = vpack.c.bf16 %v1285_v4, %v1283_v58  ;;  %v2652_v26 = vpack.c.bf16 %v1290_v43, %v1288_v12  ;;  %v2654_v27 = vpack.c.bf16 %v1289_v55, %v1287_v31  ;;  %v1297_v1 = vld [vmem:[#allocation5 + $0x150] sm:$0xff]  ;;  %v1300_v37 = vld [vmem:[#allocation5 + $0x168] sm:$0xff]  ;;  %v1302_v63 = vld [vmem:[#allocation5 + $0x178] sm:$0xff] }
 0x24b   : > { %v2662_v2 = vpack.c.bf16 %v1297_v1, %v1295_v54  ;;  %v2664_v56 = vpack.c.bf16 %v1302_v63, %v1300_v37  ;;  %v1299_v3 = vld [vmem:[#allocation5 + $0x160] sm:$0xff]  ;;  %v1301_v57 = vld [vmem:[#allocation5 + $0x170] sm:$0xff]  ;;  %v1304_v62 = vld [vmem:[#allocation5 + $0x188] sm:$0xff] }
 0x24c   : > { %2619 = vmatpush1.bf16.msk.msra.mxu0 %vm2615_vm9, %v2617_v11  ;;  %v1294_v11 = vld [vmem:[#allocation5 + $0x138] sm:$0xff]  ;;  %v2666_v19 = vpack.c.bf16 %v1301_v57, %v1299_v3  ;;  %v1303_v60 = vld [vmem:[#allocation5 + $0x180] sm:$0xff]  ;;  %v1305_v44 = vld [vmem:[#allocation5 + $0x190] sm:$0xff] }
 0x24d   : > { %2631 = vmatpush1.bf16.msra.mxu1 %v2630_v7  ;;  %v1306_v5 = vld [vmem:[#allocation5 + $0x198] sm:$0xff]  ;;  %v1308_v29 = vld [vmem:[#allocation5 + $0x1a8] sm:$0xff]  ;;  %v2670_v7 = vpack.c.bf16 %v1305_v44, %v1303_v60  ;;  %v1307_v10 = vld [vmem:[#allocation5 + $0x1a0] sm:$0xff] }
 0x24e   : > { %2633 = vmatprep.subr.bf16.mxu1 %v2632_v40  ;;  %v2668_v52 = vpack.c.bf16 %v1306_v5, %v1304_v62  ;;  %v1310_v6 = vld [vmem:[#allocation5 + $0x1b8] sm:$0xff]  ;;  %v1309_v59 = vld [vmem:[#allocation5 + $0x1b0] sm:$0xff]  ;;  %v1312_v16 = vld [vmem:[#allocation5 + $0x1c8] sm:$0xff] }
 0x24f   : > { %2412 = vmatmul.mubr.msk.f32.vlgmr.msra.gmra.mrb[16].mxu0 %vm1040_vm10, %v1036_v53  ;;  %v2656_v53 = vpack.c.bf16 %v1294_v11, %v1292_v41  ;;  %v2672_v40 = vpack.c.bf16 %v1310_v6, %v1308_v29  ;;  %v1314_v32 = vld [vmem:[#allocation5 + $0x1d8] sm:$0xff]  ;;  %v1311_v18 = vld [vmem:[#allocation5 + $0x1c0] sm:$0xff]  ;;  %v1313_v22 = vld [vmem:[#allocation5 + $0x1d0] sm:$0xff] }
 0x250   : > { %1130 = vmatprep.mubr.f32.mxu0 %v3212_v0  ;;  %v1316_v24 = vld [vmem:[#allocation5 + $0x1e8] sm:$0xff]  ;;  %v1318_v25 = vld [vmem:[#allocation5 + $0x1f8] sm:$0xff]  ;;  %v1315_v17 = vld [vmem:[#allocation5 + $0x1e0] sm:$0xff] }
 0x251   : > { %2635 = vmatpush1.bf16.msra.mxu1 %v2634_v47  ;;  %v2674_v47 = vpack.c.bf16 %v1309_v59, %v1307_v10  ;;  %v1317_v30 = vld [vmem:[#allocation5 + $0x1f0] sm:$0xff]  ;;  %v1320_v21 = vld [vmem:[#allocation5 + $0x208] sm:$0xff]  ;;  %v1319_v60 = vld [vmem:[#allocation5 + $0x200] sm:$0xff] }
 0x252   : > { %2637 = vmatprep.subr.bf16.mxu1 %v2636_v14  ;;  %v2676_v14 = vpack.c.bf16 %v1314_v32, %v1312_v16  ;;  %v2682_v34 = vpack.c.bf16 %v1317_v30, %v1315_v17  ;;  %v1321_v44 = vld [vmem:[#allocation5 + $0x210] sm:$0xff]  ;;  %v1324_v29 = vld [vmem:[#allocation5 + $0x228] sm:$0xff]  ;;  %v1326_v6 = vld [vmem:[#allocation5 + $0x238] sm:$0xff] }
 0x253   : > { %2413 = vmatmul.mubr.msk.f32.gmra.mrb[18].mxu0 %vm1040_vm10, %v1037_v48  ;;  %v1291_v48 = vld [vmem:[#allocation5 + $0x120] sm:$0xff]  ;;  %v2688_v59 = vpack.c.bf16 %v1326_v6, %v1324_v29  ;;  %v1325_v32 = vld [vmem:[#allocation5 + $0x230] sm:$0xff]  ;;  %v1332_v17 = vld [vmem:[#allocation5 + $0x268] sm:$0xff] }
 0x254   : > { %1136 = vmatprep.mubr.f32.mxu0 %v3212_v0  ;;  %v1323_v16 = vld [vmem:[#allocation5 + $0x220] sm:$0xff]  ;;  %v1334_v30 = vld [vmem:[#allocation5 + $0x278] sm:$0xff] }
 0x255   : > { %2639 = vmatpush1.bf16.msra.mxu1 %v2638_v46  ;;  %v2678_v46 = vpack.c.bf16 %v1313_v22, %v1311_v18  ;;  %v2690_v22 = vpack.c.bf16 %v1325_v32, %v1323_v16  ;;  %v1358_v29 = vld [vmem:[#allocation5 + $0x338] sm:$0xff]  ;;  %v1360_v16 = vld [vmem:[#allocation5 + $0x348] sm:$0xff] }
 0x256   : > { %2641 = vmatprep.subr.bf16.mxu1 %v2640_v61  ;;  %v2680_v61 = vpack.c.bf16 %v1318_v25, %v1316_v24  ;;  %v1362_v32 = vld [vmem:[#allocation5 + $0x358] sm:$0xff] }
 0x257   : > { %2414 = vmatmul.mubr.msk.f32.gmra.mrb[20].mxu0 %vm1040_vm10, %v1038_v50  ;;  %v1293_v50 = vld [vmem:[#allocation5 + $0x130] sm:$0xff] }
 0x258   : > { %1142 = vmatprep.mubr.f32.mxu0 %v3212_v0  ;;  %v2658_v49 = vpack.c.bf16 %v1293_v50, %v1291_v48 }
 0x259   : > { %2643 = vmatpush1.bf16.msra.mxu1 %v2642_v35  ;;  %v1322_v35 = vld [vmem:[#allocation5 + $0x218] sm:$0xff] }
 0x25a   : > { %2645 = vmatprep.subr.bf16.mxu1 %v2644_v33  ;;  %v2684_v33 = vpack.c.bf16 %v1322_v35, %v1320_v21 }
 0x25b   : > { %2415 = vmatmul.mubr.msk.f32.gmra.mrb[22].mxu0 %vm1040_vm10, %v1039_v9  ;;  %v1296_v9 = vld [vmem:[#allocation5 + $0x148] sm:$0xff] }
 0x25c   : > { %v2660_v51 = vpack.c.bf16 %v1298_v45, %v1296_v9 }
 0x25d   : > { %2647 = vmatpush1.bf16.msra.mxu1 %v2646_v36 }
 0x25e   : > { %2649 = vmatprep.subr.bf16.mxu1 %v2648_v8 }
 0x261   : > { %2651 = vmatpush1.bf16.msra.mxu1 %v2650_v42 }
 0x262   : > { %2653 = vmatprep.subr.bf16.mxu1 %v2652_v26 }
 0x265   : > { %2655 = vmatpush1.bf16.msra.mxu1 %v2654_v27 }
 0x266   : > { %2657 = vmatprep.subr.bf16.mxu1 %v2656_v53 }
 0x269   : > { %2659 = vmatpush1.bf16.msra.mxu1 %v2658_v49 }
 0x26a   : > { %2661 = vmatprep.subr.bf16.mxu1 %v2660_v51 }
 0x26d   : > { %2663 = vmatpush1.bf16.msra.mxu1 %v2662_v2 }
 0x26e   : > { %2665 = vmatprep.subr.bf16.mxu1 %v2664_v56 }
 0x271   : > { %2667 = vmatpush1.bf16.msra.mxu1 %v2666_v19 }
 0x272   : > { %2669 = vmatprep.subr.bf16.mxu1 %v2668_v52 }
 0x275   : > { %2671 = vmatpush1.bf16.msra.mxu1 %v2670_v7 }
 0x276   : > { %2673 = vmatprep.subr.bf16.mxu1 %v2672_v40  ;;  %v2686_v40 = vpack.c.bf16 %v1321_v44, %v1319_v60  ;;  %v1353_v60 = vld [vmem:[#allocation5 + $0x310] sm:$0xff]  ;;  %v1356_v44 = vld [vmem:[#allocation5 + $0x328] sm:$0xff] }
 0x279   : > { %2675 = vmatpush1.bf16.msra.mxu1 %v2674_v47  ;;  %v1328_v47 = vld [vmem:[#allocation5 + $0x248] sm:$0xff] }
 0x27a   : > { %2677 = vmatprep.subr.bf16.mxu1 %v2676_v14  ;;  %v1330_v14 = vld [vmem:[#allocation5 + $0x258] sm:$0xff] }
 0x27b   : > { %v2692_v25 = vpack.c.bf16 %v1330_v14, %v1328_v47  ;;  %v2724_v14 = vpack.c.bf16 %v1362_v32, %v1360_v16 }
 0x27d   : > { %2679 = vmatpush1.bf16.msra.mxu1 %v2678_v46  ;;  %v1327_v46 = vld [vmem:[#allocation5 + $0x240] sm:$0xff] }
 0x27e   : > { %2681 = vmatprep.subr.bf16.mxu1 %v2680_v61  ;;  %v1329_v61 = vld [vmem:[#allocation5 + $0x250] sm:$0xff] }
 0x27f   : > { %v2694_v35 = vpack.c.bf16 %v1329_v61, %v1327_v46  ;;  %v1366_v46 = vld [vmem:[#allocation5 + $0x378] sm:$0xff] }
 0x281   : > { %2683 = vmatpush1.bf16.msra.mxu1 %v2682_v34 }
 0x282   : > { %2685 = vmatprep.subr.bf16.mxu1 %v2684_v33 }
 0x322   : > { %v3744_v13 = vpop.f32.mrb[16].mxu0 }
 0x323   : > { %v1128_v38 = vpop.f32.mrb[17].mxu0  ;;  %v1157_v39 = vrot.slane %v3744_v13, 1  ;;  %v1204_v36 = vrot.slane %v3744_v13, 2 }
 0x324   : > { %v1160_v12 = vrot.slane %v1128_v38, 1  ;;  %v1207_v43 = vrot.slane %v1128_v38, 2 }
 0x326   : > { %v3746_v28 = vpop.f32.mrb[18].mxu0 }
 0x327   : > { %v1158_v8 = vrot.slane %v3746_v28, 1  ;;  %v1205_v58 = vrot.slane %v3746_v28, 2  ;;  %v3752_v4 = vpop.f32.mrb[19].mxu0 }
 0x328   : > { %v1161_v42 = vrot.slane %v3752_v4, 1  ;;  %v1208_v26 = vrot.slane %v3752_v4, 2 }
 0x329   : > { %v1159_v31 = vsel %vm377_vm0, %v1157_v39, %v1158_v8  ;;  %v1206_v55 = vsel %vm417_vm1, %v1204_v36, %v1205_v58  ;;  %v1333_v39 = vld [vmem:[#allocation5 + $0x270] sm:$0xff]  ;;  %v1336_v36 = vld [vmem:[#allocation5 + $0x288] sm:$0xff] }
 0x32a   : > { %1171 = vrot.lane.b32.xlu0 %v1159_v31, %s3217_s28  ;;  %v3759_v41 = vpop.f32.mrb[20].mxu0  ;;  %v1162_v11 = vsel %vm377_vm0, %v1160_v12, %v1161_v42  ;;  %v1209_v27 = vsel %vm417_vm1, %v1207_v43, %v1208_v26  ;;  %v1340_v31 = vld [vmem:[#allocation5 + $0x2a8] sm:$0xff] }
 0x32b   : > { %v1163_v53 = vrot.slane %v3759_v41, 1  ;;  %v1210_v48 = vrot.slane %v3759_v41, 2  ;;  %v3765_v50 = vpop.f32.mrb[21].mxu0 }
 0x32c   : > { %v1165_v9 = vrot.slane %v3765_v50, 1  ;;  %v1212_v45 = vrot.slane %v3765_v50, 2 }
 0x32d   : > { %v1164_v49 = vsel %vm377_vm0, %v1158_v8, %v1163_v53  ;;  %v1211_v51 = vsel %vm417_vm1, %v1205_v58, %v1210_v48  ;;  %v1338_v8 = vld [vmem:[#allocation5 + $0x298] sm:$0xff] }
 0x32e   : > { %1175 = vrot.lane.b32.xlu1 %v1164_v49, %s3217_s28  ;;  %v3772_v54 = vpop.f32.mrb[22].mxu0  ;;  %v1166_v1 = vsel %vm377_vm0, %v1161_v42, %v1165_v9  ;;  %v1213_v37 = vsel %vm417_vm1, %v1208_v26, %v1212_v45  ;;  %v2700_v43 = vpack.c.bf16 %v1338_v8, %v1336_v36  ;;  %v1335_v42 = vld [vmem:[#allocation5 + $0x280] sm:$0xff]  ;;  %v1337_v26 = vld [vmem:[#allocation5 + $0x290] sm:$0xff] }
 0x32f   : > { %v1167_v63 = vrot.slane %v3772_v54, 1  ;;  %v1214_v2 = vrot.slane %v3772_v54, 2  ;;  %v3778_v56 = vpop.f32.mrb[23].mxu0  ;;  %v1367_v36 = vld [vmem:[#allocation5 + $0x380] sm:$0xff]  ;;  %v1369_v8 = vld [vmem:[#allocation5 + $0x390] sm:$0xff] }
 0x330   : > { %v1169_v3 = vrot.slane %v3778_v56, 1  ;;  %v1216_v57 = vrot.slane %v3778_v56, 2 }
 0x331   : > { %v1168_v62 = vsel %vm377_vm0, %v1163_v53, %v1167_v63  ;;  %v1215_v5 = vsel %vm417_vm1, %v1210_v48, %v1214_v2  ;;  %v1339_v53 = vld [vmem:[#allocation5 + $0x2a0] sm:$0xff]  ;;  %v1341_v48 = vld [vmem:[#allocation5 + $0x2b0] sm:$0xff] }
 0x332   : > { %1183 = vrot.lane.b32.xlu1 %v1167_v63, %s3217_s28  ;;  %1179 = vrot.lane.b32.xlu0 %v1168_v62, %s3217_s28  ;;  %v1170_v19 = vsel %vm377_vm0, %v1165_v9, %v1169_v3  ;;  %v1217_v52 = vsel %vm417_vm1, %v1212_v45, %v1216_v57  ;;  %v1346_v9 = vld [vmem:[#allocation5 + $0x2d8] sm:$0xff]  ;;  %v2706_v45 = vpack.c.bf16 %v1341_v48, %v1339_v53  ;;  %v1375_v53 = vld [vmem:[#allocation5 + $0x3c0] sm:$0xff]  ;;  %v1377_v48 = vld [vmem:[#allocation5 + $0x3d0] sm:$0xff] }
 0x333   : > { %v1354_v62 = vld [vmem:[#allocation5 + $0x318] sm:$0xff]  ;;  %vm2793_vm1 = vmpackc.low %vm1783_vm15, %vm3216_vm8 }
 0x336   : > { %1218 = vrot.lane.b32.xlu1 %v1206_v55, %s3218_s29  ;;  %1173 = vrot.lane.b32.xlu0 %v1162_v11, %s3217_s28  ;;  %v1342_v55 = vld [vmem:[#allocation5 + $0x2b8] sm:$0xff]  ;;  %v2702_v11 = vpack.c.bf16 %v1337_v26, %v1335_v42  ;;  %v1371_v26 = vld [vmem:[#allocation5 + $0x3a0] sm:$0xff] }
 0x33a   : > { %1222 = vrot.lane.b32.xlu1 %v1211_v51, %s3218_s29  ;;  %1177 = vrot.lane.b32.xlu0 %v1166_v1, %s3217_s28  ;;  %v1343_v51 = vld [vmem:[#allocation5 + $0x2c0] sm:$0xff]  ;;  %v1345_v1 = vld [vmem:[#allocation5 + $0x2d0] sm:$0xff] }
 0x33b   : > { %v2710_v63 = vpack.c.bf16 %v1345_v1, %v1343_v51  ;;  %v1379_v51 = vld [vmem:[#allocation5 + $0x3e0] sm:$0xff]  ;;  %v1381_v1 = vld [vmem:[#allocation5 + $0x3f0] sm:$0xff] }
 0x33e   : > { %1226 = vrot.lane.b32.xlu1 %v1215_v5, %s3218_s29  ;;  %1181 = vrot.lane.b32.xlu0 %v1170_v19, %s3217_s28 }
 0x342   : > { %1230 = vrot.lane.b32.xlu1 %v1214_v2, %s3218_s29  ;;  %1185 = vrot.lane.b32.xlu0 %v1169_v3, %s3217_s28  ;;  %v1349_v3 = vld [vmem:[#allocation5 + $0x2f0] sm:$0xff] }
 0x346   : > { %1224 = vrot.lane.b32.xlu1 %v1213_v37, %s3218_s29  ;;  %1220 = vrot.lane.b32.xlu0 %v1209_v27, %s3218_s29  ;;  %v2704_v27 = vpack.c.bf16 %v1342_v55, %v1340_v31  ;;  %v1350_v37 = vld [vmem:[#allocation5 + $0x2f8] sm:$0xff]  ;;  %v1373_v31 = vld [vmem:[#allocation5 + $0x3b0] sm:$0xff]  ;;  %v1376_v55 = vld [vmem:[#allocation5 + $0x3c8] sm:$0xff] }
 0x34a   : > { %1228 = vrot.lane.b32.xlu0 %v1217_v52, %s3218_s29  ;;  %1232 = vrot.lane.b32.xlu1 %v1216_v57, %s3218_s29  ;;  %v1352_v57 = vld [vmem:[#allocation5 + $0x308] sm:$0xff]  ;;  %v1351_v52 = vld [vmem:[#allocation5 + $0x300] sm:$0xff] }
 0x34b   : > { %v2716_v19 = vpack.c.bf16 %v1354_v62, %v1352_v57  ;;  %v2718_v6 = vpack.c.bf16 %v1353_v60, %v1351_v52  ;;  %v1385_v57 = vld [vmem:[#allocation5 + $0x410] sm:$0xff] }
 0x39c   : > { %v3800_v7 = vpop.permute.xlu0 %1171 }
 0x39d   : > { %v1247_v10 = vsel %vm1187_vm11, %v1128_v38, %v3800_v7  ;;  %v1331_v38 = vld [vmem:[#allocation5 + $0x260] sm:$0xff] }
 0x39e   : > { %1507 = vmatprep.mubr.f32.mxu1 %v1247_v10  ;;  %v2698_v12 = vpack.c.bf16 %v1333_v39, %v1331_v38  ;;  %v1355_v10 = vld [vmem:[#allocation5 + $0x320] sm:$0xff] }
 0x39f   : > { %1508 = vmatmul.mubr.f32.vlgmr.msra.gmra.mrb[16].mxu1 %v3744_v13  ;;  %v2696_v13 = vpack.c.bf16 %v1334_v30, %v1332_v17  ;;  %v1363_v30 = vld [vmem:[#allocation5 + $0x360] sm:$0xff] }
 0x3a0   : > { %2687 = vmatpush1.bf16.msra.mxu1 %v2686_v40  ;;  %v3805_v18 = vpop.permute.xlu1 %1175  ;;  %v2720_v40 = vpack.c.bf16 %v1358_v29, %v1356_v44  ;;  %v1387_v44 = vld [vmem:[#allocation5 + $0x420] sm:$0xff]  ;;  %v1389_v29 = vld [vmem:[#allocation5 + $0x430] sm:$0xff] }
 0x3a1   : > { %v1248_v24 = vsel %vm1187_vm11, %v3752_v4, %v3805_v18  ;;  %2689 = vmatprep.subr.bf16.mxu1 %v2688_v59  ;;  %v1357_v59 = vld [vmem:[#allocation5 + $0x330] sm:$0xff] }
 0x3a2   : > { %1513 = vmatprep.mubr.f32.mxu1 %v1248_v24  ;;  %v2722_v47 = vpack.c.bf16 %v1357_v59, %v1355_v10  ;;  %v1361_v24 = vld [vmem:[#allocation5 + $0x350] sm:$0xff]  ;;  %v1394_v10 = vld [vmem:[#allocation5 + $0x458] sm:$0xff] }
 0x3a3   : > { %1514 = vmatmul.mubr.f32.gmra.mrb[18].mxu1 %v3746_v28 }
 0x3a4   : > { %2691 = vmatpush1.bf16.msra.mxu1 %v2690_v22  ;;  %v3811_v34 = vpop.permute.xlu1 %1183  ;;  %v3813_v21 = vpop.permute.xlu0 %1179  ;;  %v1359_v22 = vld [vmem:[#allocation5 + $0x340] sm:$0xff] }
 0x3a5   : > { %v1249_v33 = vsel %vm1187_vm11, %v3765_v50, %v3813_v21  ;;  %2693 = vmatprep.subr.bf16.mxu1 %v2692_v25  ;;  %v1250_v28 = vsel %vm1187_vm11, %v3778_v56, %v3811_v34  ;;  %v1344_v50 = vld [vmem:[#allocation5 + $0x2c8] sm:$0xff]  ;;  %v1347_v56 = vld [vmem:[#allocation5 + $0x2e0] sm:$0xff]  ;;  %v2726_v61 = vpack.c.bf16 %v1361_v24, %v1359_v22  ;;  %v1393_v24 = vld [vmem:[#allocation5 + $0x450] sm:$0xff] }
 0x3a6   : > { %1519 = vmatprep.mubr.f32.mxu1 %v1249_v33  ;;  %v2708_v49 = vpack.c.bf16 %v1346_v9, %v1344_v50  ;;  %v2714_v5 = vpack.c.bf16 %v1349_v3, %v1347_v56  ;;  %v1364_v25 = vld [vmem:[#allocation5 + $0x368] sm:$0xff]  ;;  %v1382_v9 = vld [vmem:[#allocation5 + $0x3f8] sm:$0xff]  ;;  %v1383_v3 = vld [vmem:[#allocation5 + $0x400] sm:$0xff] }
 0x3a7   : > { %1520 = vmatmul.mubr.f32.gmra.mrb[20].mxu1 %v3759_v41  ;;  %v2728_v17 = vpack.c.bf16 %v1366_v46, %v1364_v25  ;;  %v1368_v33 = vld [vmem:[#allocation5 + $0x388] sm:$0xff]  ;;  %v2750_v52 = vpack.c.bf16 %v1385_v57, %v1383_v3  ;;  %v1391_v22 = vld [vmem:[#allocation5 + $0x440] sm:$0xff] }
 0x3a8   : > { %2695 = vmatpush1.bf16.msra.mxu1 %v2694_v35  ;;  %v3822_v58 = vpop.permute.xlu1 %1218  ;;  %v3824_v4 = vpop.permute.xlu0 %1173  ;;  %1525 = vmatprep.mubr.f32.mxu1 %v1250_v28  ;;  %v1365_v35 = vld [vmem:[#allocation5 + $0x370] sm:$0xff]  ;;  %v1372_v28 = vld [vmem:[#allocation5 + $0x3a8] sm:$0xff] }
 0x3a9   : > { %2697 = vmatprep.subr.bf16.mxu1 %v2696_v13  ;;  %v1251_v41 = vsel %vm1234_vm12, %v3824_v4, %v3822_v58  ;;  %v1370_v13 = vld [vmem:[#allocation5 + $0x398] sm:$0xff]  ;;  %v2730_v38 = vpack.c.bf16 %v1365_v35, %v1363_v30  ;;  %v1380_v50 = vld [vmem:[#allocation5 + $0x3e8] sm:$0xff]  ;;  %v1395_v35 = vld [vmem:[#allocation5 + $0x460] sm:$0xff] }
 0x3aa   : > { %v2732_v39 = vpack.c.bf16 %v1370_v13, %v1368_v33  ;;  %v1397_v33 = vld [vmem:[#allocation5 + $0x470] sm:$0xff] }
 0x3ab   : > { %1526 = vmatmul.mubr.f32.gmra.mrb[22].mxu1 %v3772_v54  ;;  %v1348_v54 = vld [vmem:[#allocation5 + $0x2e8] sm:$0xff] }
 0x3ac   : > { %2699 = vmatpush1.bf16.msra.mxu1 %v2698_v12  ;;  %1596 = vmatprep.mubr.f32.mxu1 %v1251_v41  ;;  %v2712_v2 = vpack.c.bf16 %v1350_v37, %v1348_v54  ;;  %v1374_v12 = vld [vmem:[#allocation5 + $0x3b8] sm:$0xff]  ;;  %v1384_v54 = vld [vmem:[#allocation5 + $0x408] sm:$0xff]  ;;  %v3830_v62 = vpop.permute.xlu1 %1222 }
 0x3ad   : > { %2701 = vmatprep.subr.bf16.mxu1 %v2700_v43  ;;  %v2734_v43 = vpack.c.bf16 %v1369_v8, %v1367_v36  ;;  %v2736_v42 = vpack.c.bf16 %v1374_v12, %v1372_v28  ;;  %v1378_v41 = vld [vmem:[#allocation5 + $0x3d8] sm:$0xff]  ;;  %v2762_v8 = vpack.c.bf16 %v1397_v33, %v1395_v35  ;;  %v1399_v12 = vld [vmem:[#allocation5 + $0x480] sm:$0xff] }
 0x3ae   : > { %v1386_v37 = vld [vmem:[#allocation5 + $0x418] sm:$0xff] }
 0x3af   : > { %v2748_v56 = vpack.c.bf16 %v1386_v37, %v1384_v54  ;;  %v1411_v37 = vld [vmem:[#allocation5 + $0x4e0] sm:$0xff] }
 0x3b0   : > { %2703 = vmatpush1.bf16.msra.mxu1 %v2702_v11  ;;  %v2738_v11 = vpack.c.bf16 %v1373_v31, %v1371_v26  ;;  %v3837_v32 = vpop.permute.xlu1 %1226  ;;  %v1404_v26 = vld [vmem:[#allocation5 + $0x4a8] sm:$0xff]  ;;  %v1406_v31 = vld [vmem:[#allocation5 + $0x4b8] sm:$0xff] }
 0x3b1   : > { %2705 = vmatprep.subr.bf16.mxu1 %v2704_v27  ;;  %v2740_v27 = vpack.c.bf16 %v1378_v41, %v1376_v55  ;;  %v2768_v41 = vpack.c.bf16 %v1406_v31, %v1404_v26 }
 0x3b4   : > { %2707 = vmatpush1.bf16.msra.mxu1 %v2706_v45  ;;  %v2742_v45 = vpack.c.bf16 %v1377_v48, %v1375_v53  ;;  %v3843_v13 = vpop.permute.xlu1 %1230  ;;  %v1408_v53 = vld [vmem:[#allocation5 + $0x4c8] sm:$0xff]  ;;  %v1410_v48 = vld [vmem:[#allocation5 + $0x4d8] sm:$0xff] }
 0x3b5   : > { %2709 = vmatprep.subr.bf16.mxu1 %v2708_v49  ;;  %v2744_v49 = vpack.c.bf16 %v1382_v9, %v1380_v50  ;;  %v2772_v9 = vpack.c.bf16 %v1410_v48, %v1408_v53  ;;  %v1774_v53 = vld [vmem:[%s4264_s6] sm:$0xff] }
 0x3b6   : > { %2552 = vmatprep.mubr.msk.f32.mxu0 %vm1776_vm13, %v1774_v53  ;;  %v1905_v53 = vld [vmem:[%s4265_s7 + $0x48] sm:$0xff] }
 0x3b8   : > { %2711 = vmatpush1.bf16.msra.mxu1 %v2710_v63  ;;  %v2746_v63 = vpack.c.bf16 %v1381_v1, %v1379_v51  ;;  %v1414_v51 = vld [vmem:[#allocation5 + $0x4f8] sm:$0xff] }
 0x3b9   : > { %2713 = vmatprep.subr.bf16.mxu1 %v2712_v2  ;;  %v1178_v2 = vpop.permute.xlu0 %1177 }
 0x3ba   : > { %v1252_v16 = vsel %vm1234_vm12, %v1178_v2, %v3830_v62  ;;  %v1189_v25 = vsel %vm1187_vm11, %v3805_v18, %v1178_v2  ;;  %v1400_v18 = vld [vmem:[#allocation5 + $0x488] sm:$0xff] }
 0x3bb   : > { %v1416_v2 = vld [vmem:[#allocation5 + $0x508] sm:$0xff] }
 0x3bc   : > { %2715 = vmatpush1.bf16.msra.mxu1 %v2714_v5  ;;  %v1388_v5 = vld [vmem:[#allocation5 + $0x428] sm:$0xff] }
 0x3bd   : > { %2717 = vmatprep.subr.bf16.mxu1 %v2716_v19  ;;  %v1390_v19 = vld [vmem:[#allocation5 + $0x438] sm:$0xff]  ;;  %v1182_v59 = vpop.permute.xlu0 %1181 }
 0x3be   : > { %v2752_v60 = vpack.c.bf16 %v1390_v19, %v1388_v5  ;;  %v1253_v46 = vsel %vm1234_vm12, %v1182_v59, %v3837_v32  ;;  %v1415_v5 = vld [vmem:[#allocation5 + $0x500] sm:$0xff]  ;;  %v1417_v19 = vld [vmem:[#allocation5 + $0x510] sm:$0xff] }
 0x3c0   : > { %2719 = vmatpush1.bf16.msra.mxu1 %v2718_v6  ;;  %v1188_v6 = vsel %vm1187_vm11, %v3800_v7, %v3824_v4  ;;  %v1396_v7 = vld [vmem:[#allocation5 + $0x468] sm:$0xff]  ;;  %v1398_v4 = vld [vmem:[#allocation5 + $0x478] sm:$0xff] }
 0x3c1   : > { %2721 = vmatprep.subr.bf16.mxu1 %v2720_v40  ;;  %v1392_v40 = vld [vmem:[#allocation5 + $0x448] sm:$0xff]  ;;  %v2760_v30 = vpack.c.bf16 %v1398_v4, %v1396_v7 }
 0x3c4   : > { %2723 = vmatpush1.bf16.msra.mxu1 %v2722_v47  ;;  %v2754_v47 = vpack.c.bf16 %v1389_v29, %v1387_v44  ;;  %v2782_v44 = vpack.c.bf16 %v1417_v19, %v1415_v5 }
 0x3c5   : > { %2725 = vmatprep.subr.bf16.mxu1 %v2724_v14  ;;  %v2756_v14 = vpack.c.bf16 %v1394_v10, %v1392_v40  ;;  %v1421_v40 = vld [vmem:[#allocation5 + $0x530] sm:$0xff] }
 0x3c8   : > { %2727 = vmatpush1.bf16.msra.mxu1 %v2726_v61  ;;  %v2758_v61 = vpack.c.bf16 %v1393_v24, %v1391_v22 }
 0x3c9   : > { %2729 = vmatprep.subr.bf16.mxu1 %v2728_v17  ;;  %v1186_v17 = vpop.permute.xlu0 %1185 }
 0x3ca   : > { %v1254_v36 = vsel %vm1234_vm12, %v1186_v17, %v3843_v13 }
 0x3cc   : > { %2731 = vmatpush1.bf16.msra.mxu1 %v2730_v38  ;;  %v1190_v38 = vsel %vm1187_vm11, %v3813_v21, %v1182_v59 }
 0x3cd   : > { %2733 = vmatprep.subr.bf16.mxu1 %v2732_v39  ;;  %v1402_v39 = vld [vmem:[#allocation5 + $0x498] sm:$0xff]  ;;  %v1221_v55 = vpop.permute.xlu0 %1220 }
 0x3ce   : > { %v2764_v28 = vpack.c.bf16 %v1402_v39, %v1400_v18  ;;  %v1235_v59 = vsel %vm1234_vm12, %v3822_v58, %v1221_v55 }
 0x3d0   : > { %2735 = vmatpush1.bf16.msra.mxu1 %v2734_v43  ;;  %v1401_v43 = vld [vmem:[#allocation5 + $0x490] sm:$0xff] }
 0x3d1   : > { %2737 = vmatprep.subr.bf16.mxu1 %v2736_v42  ;;  %v1191_v42 = vsel %vm1187_vm11, %v3811_v34, %v1186_v17  ;;  %v2766_v21 = vpack.c.bf16 %v1401_v43, %v1399_v12  ;;  %v1409_v34 = vld [vmem:[#allocation5 + $0x4d0] sm:$0xff] }
 0x3d4   : > { %2739 = vmatpush1.bf16.msra.mxu1 %v2738_v11  ;;  %v1403_v11 = vld [vmem:[#allocation5 + $0x4a0] sm:$0xff] }
 0x3d5   : > { %2741 = vmatprep.subr.bf16.mxu1 %v2740_v27  ;;  %v1405_v27 = vld [vmem:[#allocation5 + $0x4b0] sm:$0xff] }
 0x3d6   : > { %v2770_v50 = vpack.c.bf16 %v1405_v27, %v1403_v11 }
 0x3d8   : > { %2743 = vmatpush1.bf16.msra.mxu1 %v2742_v45  ;;  %v1407_v45 = vld [vmem:[#allocation5 + $0x4c0] sm:$0xff] }
 0x3d9   : > { %2745 = vmatprep.subr.bf16.mxu1 %v2744_v49  ;;  %v1412_v49 = vld [vmem:[#allocation5 + $0x4e8] sm:$0xff]  ;;  %v2774_v1 = vpack.c.bf16 %v1409_v34, %v1407_v45 }
 0x3da   : > { %v2776_v54 = vpack.c.bf16 %v1414_v51, %v1412_v49 }
 0x3dc   : > { %2747 = vmatpush1.bf16.msra.mxu1 %v2746_v63  ;;  %v1413_v63 = vld [vmem:[#allocation5 + $0x4f0] sm:$0xff] }
 0x3dd   : > { %2749 = vmatprep.subr.bf16.mxu1 %v2748_v56  ;;  %v1418_v56 = vld [vmem:[#allocation5 + $0x518] sm:$0xff]  ;;  %v2778_v3 = vpack.c.bf16 %v1413_v63, %v1411_v37 }
 0x3de   : > { %v2780_v57 = vpack.c.bf16 %v1418_v56, %v1416_v2 }
 0x3df   : > { %1597 = vmatmul.mubr.f32.vlgmr.msra.gmra.mrb[16].mxu1 %v1188_v6  ;;  %v1419_v6 = vld [vmem:[#allocation5 + $0x520] sm:$0xff] }
 0x3e0   : > { %1602 = vmatprep.mubr.f32.mxu1 %v1252_v16  ;;  %2751 = vmatpush1.bf16.msra.mxu1 %v2750_v52  ;;  %v1420_v52 = vld [vmem:[#allocation5 + $0x528] sm:$0xff]  ;;  %v2786_v10 = vpack.c.bf16 %v1421_v40, %v1419_v6  ;;  %v1225_v16 = vpop.permute.xlu1 %1224 }
 0x3e1   : > { %2753 = vmatprep.subr.bf16.mxu1 %v2752_v60  ;;  %v1422_v60 = vld [vmem:[#allocation5 + $0x538] sm:$0xff] }
 0x3e2   : > { %v2784_v29 = vpack.c.bf16 %v1422_v60, %v1420_v52 }
 0x3e3   : > { %1603 = vmatmul.mubr.f32.gmra.mrb[18].mxu1 %v1189_v25  ;;  %v1423_v25 = vld [vmem:[%s4263_s5] sm:$0x3] }
 0x3e4   : > { %1608 = vmatprep.mubr.f32.mxu1 %v1253_v46  ;;  %2755 = vmatpush1.bf16.msra.mxu1 %v2754_v47  ;;  %v1236_v47 = vsel %vm1234_vm12, %v3830_v62, %v1225_v16  ;;  %v1233_v24 = vpop.permute.xlu1 %1232  ;;  %v1428_v62 = vrot.slane %v1423_v25, %v523_v20  ;;  %v1432_v7 = vrot.slane %v1423_v25, %v527_v23 }
 0x3e5   : > { %2757 = vmatprep.subr.bf16.mxu1 %v2756_v14  ;;  %v1229_v14 = vpop.permute.xlu0 %1228  ;;  %v1238_v58 = vsel %vm1234_vm12, %v3843_v13, %v1233_v24 }
 0x3e6   : > { %v1237_v22 = vsel %vm1234_vm12, %v3837_v32, %v1229_v14 }
 0x3e7   : > { %1609 = vmatmul.mubr.f32.gmra.mrb[20].mxu1 %v1190_v38 }
 0x3e8   : > { %1614 = vmatprep.mubr.f32.mxu1 %v1254_v36  ;;  %2759 = vmatpush1.bf16.msra.mxu1 %v2758_v61 }
 0x3e9   : > { %2761 = vmatprep.subr.bf16.mxu1 %v2760_v30 }
 0x3eb   : > { %1615 = vmatmul.mubr.f32.gmra.mrb[22].mxu1 %v1191_v42 }
 0x3ec   : > { %2763 = vmatpush1.bf16.msra.mxu1 %v2762_v8  ;;  %2416 = vmatprep.mubr.msk.f32.mxu1 %vm909_vm6, %v1221_v55 }
 0x3ed   : > { %2765 = vmatprep.subr.bf16.mxu1 %v2764_v28 }
 0x3f0   : > { %2767 = vmatpush1.bf16.msra.mxu1 %v2766_v21 }
 0x3f1   : > { %2769 = vmatprep.subr.bf16.mxu1 %v2768_v41 }
 0x3f4   : > { %2771 = vmatpush1.bf16.msra.mxu1 %v2770_v50 }
 0x3f5   : > { %2773 = vmatprep.subr.bf16.mxu1 %v2772_v9 }
 0x3f8   : > { %2775 = vmatpush1.bf16.msra.mxu1 %v2774_v1 }
 0x3f9   : > { %2777 = vmatprep.subr.bf16.mxu1 %v2776_v54 }
 0x3fc   : > { %2779 = vmatpush1.bf16.msra.mxu1 %v2778_v3 }
 0x3fd   : > { %2781 = vmatprep.subr.bf16.mxu1 %v2780_v57 }
 0x400   : > { %2783 = vmatpush1.bf16.msra.mxu1 %v2782_v44 }
 0x401   : > { %2785 = vmatprep.subr.bf16.mxu1 %v2784_v29 }
 0x404   : > { %2787 = vmatpush1.bf16.msra.mxu1 %v2786_v10 }
 0x407   : > { %1686 = vmatmul.mubr.f32.vlgmr.msra.gmra.mrb[16].mxu1 %v1235_v59 }
 0x408   : > { %2417 = vmatprep.mubr.msk.f32.mxu1 %vm909_vm6, %v1225_v16 }
 0x40b   : > { %1692 = vmatmul.mubr.f32.gmra.mrb[18].mxu1 %v1236_v47 }
 0x40c   : > { %2418 = vmatprep.mubr.msk.f32.mxu1 %vm909_vm6, %v1229_v14 }
 0x40f   : > { %1698 = vmatmul.mubr.f32.gmra.mrb[20].mxu1 %v1237_v22 }
 0x410   : > { %2419 = vmatprep.mubr.msk.f32.mxu1 %vm909_vm6, %v1233_v24 }
 0x413   : > { %1704 = vmatmul.mubr.f32.gmra.mrb[22].mxu1 %v1238_v58 }
 0x4da   : > { %v1687_v4 = vpop.f32.mrb[16].mxu1 }
 0x4db   : > { %v2897_v32 = vadd.f32 %v1687_v4, %v1428_v62  ;;  %v1689_v46 = vpop.f32.mrb[17].mxu1  ;;  %v1912_v4 = vld [vmem:[%s4265_s7 + $0x80] sm:$0xff] }
 0x4dc   : > { %v2898_v61 = vadd.f32 %v1689_v46, %v1432_v7  ;;  %v1896_v46 = vld [vmem:[%s4265_s7] sm:$0xff] }
 0x4dd   : > { %v1710_v17 = vmax.f32 %v2897_v32, 0.0  ;;  %v1913_v32 = vld [vmem:[%s4265_s7 + $0x88] sm:$0xff] }
 0x4de   : > { %v1711_v30 = vmax.f32 %v2898_v61, 0.0  ;;  %v1693_v35 = vpop.f32.mrb[18].mxu1  ;;  %v2798_v61 = vpack.c.bf16 %v1913_v32, %v1912_v4 }
 0x4df   : > { %v2899_v33 = vadd.f32 %v1693_v35, %v1428_v62  ;;  %v1695_v13 = vpop.f32.mrb[19].mxu1  ;;  %v1915_v35 = vld [vmem:[%s4265_s7 + $0x98] sm:$0xff] }
 0x4e0   : > { %v3058_v38 = vpack.i.bf16 %v1711_v30, %v1710_v17  ;;  %v2900_v18 = vadd.f32 %v1695_v13, %v1432_v7  ;;  %v1914_v30 = vld [vmem:[%s4265_s7 + $0x90] sm:$0xff] }
 0x4e1   : > { %v1712_v39 = vmax.f32 %v2899_v33, 0.0  ;;  %v2802_v13 = vpack.c.bf16 %v1915_v35, %v1914_v30  ;;  %v1930_v30 = vld [vmem:[%s4265_s7 + $0x110] sm:$0xff]  ;;  %v1931_v35 = vld [vmem:[%s4265_s7 + $0x118] sm:$0xff] }
 0x4e2   : > { %v1713_v36 = vmax.f32 %v2900_v18, 0.0  ;;  %3059 = vrot.lane.b32.xlu0 %v3058_v38, %s3219_s17  ;;  %v1699_v8 = vpop.f32.mrb[20].mxu1  ;;  %v1898_v38 = vld [vmem:[%s4265_s7 + $0x10] sm:$0xff]  ;;  %v1899_v18 = vld [vmem:[%s4265_s7 + $0x18] sm:$0xff] }
 0x4e3   : > { %v2901_v20 = vadd.f32 %v1699_v8, %v1428_v62  ;;  %v1701_v28 = vpop.f32.mrb[21].mxu1  ;;  %v2804_v8 = vpack.c.bf16 %v1899_v18, %v1898_v38 }
 0x4e4   : > { %v3063_v15 = vpack.i.bf16 %v1713_v36, %v1712_v39  ;;  %v2902_v23 = vadd.f32 %v1701_v28, %v1432_v7  ;;  %v1917_v36 = vld [vmem:[%s4265_s7 + $0xa8] sm:$0xff]  ;;  %v1900_v28 = vld [vmem:[%s4265_s7 + $0x20] sm:$0xff] }
 0x4e5   : > { %v1714_v12 = vmax.f32 %v2901_v20, 0.0 }
 0x4e6   : > { %v1715_v43 = vmax.f32 %v2902_v23, 0.0  ;;  %3064 = vrot.lane.b32.xlu1 %v3063_v15, %s3219_s17  ;;  %v1705_v42 = vpop.f32.mrb[22].mxu1  ;;  %v1901_v15 = vld [vmem:[%s4265_s7 + $0x28] sm:$0xff]  ;;  %v1918_v23 = vld [vmem:[%s4265_s7 + $0xb0] sm:$0xff] }
 0x4e7   : > { %v2903_v26 = vadd.f32 %v1705_v42, %v1428_v62  ;;  %v1707_v31 = vpop.f32.mrb[23].mxu1 }
 0x4e8   : > { %v3068_v55 = vpack.i.bf16 %v1715_v43, %v1714_v12  ;;  %v2904_v21 = vadd.f32 %v1707_v31, %v1432_v7  ;;  %v1775_v7 = vld [vmem:[%s4264_s6 + $0x8] sm:$0x3f]  ;;  %v2808_v43 = vpack.c.bf16 %v1901_v15, %v1900_v28  ;;  %v1903_v31 = vld [vmem:[%s4265_s7 + $0x38] sm:$0xff]  ;;  %v1950_v15 = vld [vmem:[%s4265_s7 + $0x1b0] sm:$0xff] }
 0x4e9   : > { %v1716_v41 = vmax.f32 %v2903_v26, 0.0  ;;  %v1902_v26 = vld [vmem:[%s4265_s7 + $0x30] sm:$0xff]  ;;  %v1933_v28 = vld [vmem:[%s4265_s7 + $0x128] sm:$0xff] }
 0x4ea   : > { %v1717_v11 = vmax.f32 %v2904_v21, 0.0  ;;  %3069 = vrot.lane.b32.xlu0 %v3068_v55, %s3219_s17  ;;  %v1920_v55 = vld [vmem:[%s4265_s7 + $0xc0] sm:$0xff]  ;;  %v1921_v21 = vld [vmem:[%s4265_s7 + $0xc8] sm:$0xff] }
 0x4ec   : > { %v3073_v27 = vpack.i.bf16 %v1717_v11, %v1716_v41  ;;  %v2814_v11 = vpack.c.bf16 %v1921_v21, %v1920_v55  ;;  %v1953_v55 = vld [vmem:[%s4265_s7 + $0x1c8] sm:$0xff] }
 0x4ee   : > { %3074 = vrot.lane.b32.xlu1 %v3073_v27, %s3219_s17  ;;  %v1904_v27 = vld [vmem:[%s4265_s7 + $0x40] sm:$0xff]  ;;  %s2387_s17 = sshll.u32 %s353_s16, 1 }
 0x554   : > { %v3060_v48 = vpop.permute.xlu0 %3059 }
 0x555   : > { %v3062_v50 = vunpack.i.h.bf16 %v3060_v48  ;;  %v3061_v9 = vunpack.i.l.bf16 %v3060_v48  ;;  %v1922_v48 = vld [vmem:[%s4265_s7 + $0xd0] sm:$0xff] }
 0x557   : > { %v1743_v34 = vsel %vm1742_vm14, %v3061_v9, %v3062_v50  ;;  %v1923_v50 = vld [vmem:[%s4265_s7 + $0xd8] sm:$0xff]  ;;  %v2816_v9 = vpack.c.bf16 %v1905_v53, %v1904_v27  ;;  %v1937_v27 = vld [vmem:[%s4265_s7 + $0x148] sm:$0xff]  ;;  %v1954_v53 = vld [vmem:[%s4265_s7 + $0x1d0] sm:$0xff] }
 0x558   : > { %v3065_v45 = vpop.permute.xlu1 %3064  ;;  %v1751_v54 = vmax.f32 %v1710_v17, %v1743_v34  ;;  %v1897_v17 = vld [vmem:[%s4265_s7 + $0x8] sm:$0xff]  ;;  %v1906_v34 = vld [vmem:[%s4265_s7 + $0x50] sm:$0xff] }
 0x559   : > { %v3067_v49 = vunpack.i.h.bf16 %v3065_v45  ;;  %v3066_v51 = vunpack.i.l.bf16 %v3065_v45  ;;  %v2800_v33 = vpack.c.bf16 %v1897_v17, %v1896_v46  ;;  %v2818_v45 = vpack.c.bf16 %v1923_v50, %v1922_v48  ;;  %v1955_v48 = vld [vmem:[%s4265_s7 + $0x1d8] sm:$0xff] }
 0x55a   : > { %v1759_v5 = vrot.slane %v1751_v54, 1 }
 0x55b   : > { %v1744_v1 = vsel %vm1742_vm14, %v3066_v51, %v3067_v49  ;;  %v1907_v49 = vld [vmem:[%s4265_s7 + $0x58] sm:$0xff]  ;;  %v1924_v51 = vld [vmem:[%s4265_s7 + $0xe0] sm:$0xff] }
 0x55c   : > { %v1752_v37 = vmax.f32 %v1712_v39, %v1744_v1  ;;  %v3070_v63 = vpop.permute.xlu0 %3069  ;;  %v1916_v39 = vld [vmem:[%s4265_s7 + $0xa0] sm:$0xff]  ;;  %v1925_v1 = vld [vmem:[%s4265_s7 + $0xe8] sm:$0xff] }
 0x55d   : > { %v3072_v2 = vunpack.i.h.bf16 %v3070_v63  ;;  %v3071_v56 = vunpack.i.l.bf16 %v3070_v63  ;;  %v2806_v20 = vpack.c.bf16 %v1917_v36, %v1916_v39  ;;  %v1908_v63 = vld [vmem:[%s4265_s7 + $0x60] sm:$0xff]  ;;  %v2836_v39 = vpack.c.bf16 %v1931_v35, %v1930_v30  ;;  %v1982_v30 = vld [vmem:[%s4265_s7 + $0x2b0] sm:$0xff]  ;;  %v1983_v35 = vld [vmem:[%s4265_s7 + $0x2b8] sm:$0xff] }
 0x55e   : > { %v1760_v3 = vrot.slane %v1752_v37, 1 }
 0x55f   : > { %v1745_v57 = vsel %vm1742_vm14, %v3071_v56, %v3072_v2  ;;  %v1909_v2 = vld [vmem:[%s4265_s7 + $0x68] sm:$0xff]  ;;  %v1926_v56 = vld [vmem:[%s4265_s7 + $0xf0] sm:$0xff] }
 0x560   : > { %v1753_v19 = vmax.f32 %v1714_v12, %v1745_v57  ;;  %v3075_v52 = vpop.permute.xlu1 %3074  ;;  %v1761_v6 = vsel %vm377_vm0, %v1759_v5, %v1760_v3  ;;  %v1919_v12 = vld [vmem:[%s4265_s7 + $0xb8] sm:$0xff]  ;;  %v2824_v57 = vpack.c.bf16 %v1909_v2, %v1908_v63  ;;  %v1941_v63 = vld [vmem:[%s4265_s7 + $0x168] sm:$0xff]  ;;  %v1958_v2 = vld [vmem:[%s4265_s7 + $0x1f0] sm:$0xff] }
 0x561   : > { %v3077_v60 = vunpack.i.h.bf16 %v3075_v52  ;;  %v3076_v44 = vunpack.i.l.bf16 %v3075_v52  ;;  %v1770_v16 = vmax.f32 %v1751_v54, %v1761_v6  ;;  %v2810_v42 = vpack.c.bf16 %v1919_v12, %v1918_v23  ;;  %v1911_v52 = vld [vmem:[%s4265_s7 + $0x78] sm:$0xff] }
 0x562   : > { %v1762_v29 = vrot.slane %v1753_v19, 1  ;;  %v2820_v54 = vpack.c.bf16 %v1907_v49, %v1906_v34  ;;  %v1951_v23 = vld [vmem:[%s4265_s7 + $0x1b8] sm:$0xff]  ;;  %v1956_v49 = vld [vmem:[%s4265_s7 + $0x1e0] sm:$0xff] }
 0x563   : > { %v1746_v40 = vsel %vm1742_vm14, %v3076_v44, %v3077_v60  ;;  %v1944_v44 = vld [vmem:[%s4265_s7 + $0x180] sm:$0xff]  ;;  %v1939_v34 = vld [vmem:[%s4265_s7 + $0x158] sm:$0xff] }
 0x564   : > { %v1754_v10 = vmax.f32 %v1716_v41, %v1746_v40  ;;  %v1763_v59 = vsel %vm377_vm0, %v1760_v3, %v1762_v29  ;;  %v2812_v41 = vpack.c.bf16 %v1903_v31, %v1902_v26  ;;  %v1927_v3 = vld [vmem:[%s4265_s7 + $0xf8] sm:$0xff]  ;;  %v1952_v31 = vld [vmem:[%s4265_s7 + $0x1c0] sm:$0xff] }
 0x565   : > { %v1771_v47 = vmax.f32 %v1752_v37, %v1763_v59  ;;  %v2822_v37 = vpack.c.bf16 %v1925_v1, %v1924_v51  ;;  %v2826_v5 = vpack.c.bf16 %v1927_v3, %v1926_v56  ;;  %v1935_v26 = vld [vmem:[%s4265_s7 + $0x138] sm:$0xff]  ;;  %v1957_v51 = vld [vmem:[%s4265_s7 + $0x1e8] sm:$0xff] }
 0x566   : > { %v1764_v14 = vrot.slane %v1754_v10, 1  ;;  %v1959_v56 = vld [vmem:[%s4265_s7 + $0x1f8] sm:$0xff] }
 0x567   : > { %v2788_v22 = vpack.c.bf16 %v1771_v47, %v1770_v16 }
 0x568   : > { %v1773_v24 = vmax.f32 %v1754_v10, %v1764_v14  ;;  %v1765_v58 = vsel %vm377_vm0, %v1762_v29, %v1764_v14  ;;  %v1945_v29 = vld [vmem:[%s4265_s7 + $0x188] sm:$0xff]  ;;  %vm1887_vm0 = vcmask 916480  }
 0x569   : > { %2789 = vmatprep.subr.bf16.mxu0 %v2788_v22  ;;  %v1772_v25 = vmax.f32 %v1753_v19, %v1765_v58  ;;  %v1910_v19 = vld [vmem:[%s4265_s7 + $0x70] sm:$0xff]  ;;  %v2830_v6 = vpack.c.bf16 %v1945_v29, %v1944_v44  ;;  %v1929_v58 = vld [vmem:[%s4265_s7 + $0x108] sm:$0xff] }
 0x56a   : > { %2791 = vmatpush3.bf16.msra.mxu0 %v2788_v22  ;;  %v2828_v60 = vpack.c.bf16 %v1911_v52, %v1910_v19  ;;  %v1943_v19 = vld [vmem:[%s4265_s7 + $0x178] sm:$0xff]  ;;  %v1976_v52 = vld [vmem:[%s4265_s7 + $0x280] sm:$0xff] }
 0x56b   : > { %v2792_v62 = vpack.c.bf16 %v1773_v24, %v1772_v25  ;;  %v1928_v24 = vld [vmem:[%s4265_s7 + $0x100] sm:$0xff]  ;;  %v1946_v25 = vld [vmem:[%s4265_s7 + $0x190] sm:$0xff] }
 0x56c   : > { %v2832_v32 = vpack.c.bf16 %v1929_v58, %v1928_v24  ;;  %v1962_v24 = vld [vmem:[%s4265_s7 + $0x210] sm:$0xff]  ;;  %v1963_v58 = vld [vmem:[%s4265_s7 + $0x218] sm:$0xff] }
 0x56d   : > { %2794 = vmatprep.subr.msk.bf16.mxu0 %vm2793_vm1, %v2792_v62 }
 0x56e   : > { %2797 = vmatpush3.bf16.msk.msra.mxu0 %vm2793_vm1, %v2792_v62  ;;  %v1947_v62 = vld [vmem:[%s4265_s7 + $0x198] sm:$0xff] }
 0x56f   : > { %2799 = vmatprep.subr.bf16.mxu0 %v2798_v61  ;;  %v2834_v17 = vpack.c.bf16 %v1947_v62, %v1946_v25  ;;  %v1980_v62 = vld [vmem:[%s4265_s7 + $0x2a0] sm:$0xff] }
 0x571   : > { %2553 = vmatmul.mubr.msk.f32.vlgmr.msra.gmra.mrb[24].mxu0 %vm1776_vm13, %v1775_v7 }
 0x572   : > { %2801 = vmatpush3.bf16.msra.mxu0 %v2800_v33  ;;  %v1948_v33 = vld [vmem:[%s4265_s7 + $0x1a0] sm:$0xff] }
 0x573   : > { %2803 = vmatprep.subr.bf16.mxu0 %v2802_v13  ;;  %v1949_v13 = vld [vmem:[%s4265_s7 + $0x1a8] sm:$0xff] }
 0x576   : > { %2805 = vmatpush3.bf16.msra.mxu0 %v2804_v8  ;;  %v2838_v8 = vpack.c.bf16 %v1949_v13, %v1948_v33  ;;  %v2874_v13 = vpack.c.bf16 %v1983_v35, %v1982_v30 }
 0x577   : > { %2807 = vmatprep.subr.bf16.mxu0 %v2806_v20  ;;  %v1932_v20 = vld [vmem:[%s4265_s7 + $0x120] sm:$0xff] }
 0x578   : > { %v2840_v12 = vpack.c.bf16 %v1933_v28, %v1932_v20 }
 0x57a   : > { %2809 = vmatpush3.bf16.msra.mxu0 %v2808_v43  ;;  %v2842_v43 = vpack.c.bf16 %v1951_v23, %v1950_v15  ;;  %v1968_v15 = vld [vmem:[%s4265_s7 + $0x240] sm:$0xff]  ;;  %v1969_v23 = vld [vmem:[%s4265_s7 + $0x248] sm:$0xff] }
 0x57b   : > { %2811 = vmatprep.subr.bf16.mxu0 %v2810_v42  ;;  %v1934_v42 = vld [vmem:[%s4265_s7 + $0x130] sm:$0xff] }
 0x57c   : > { %v2844_v21 = vpack.c.bf16 %v1935_v26, %v1934_v42  ;;  %v2880_v42 = vpack.c.bf16 %v1969_v23, %v1968_v15 }
 0x57e   : > { %2813 = vmatpush3.bf16.msra.mxu0 %v2812_v41  ;;  %v2846_v41 = vpack.c.bf16 %v1953_v55, %v1952_v31  ;;  %v1970_v31 = vld [vmem:[%s4265_s7 + $0x250] sm:$0xff]  ;;  %v1971_v55 = vld [vmem:[%s4265_s7 + $0x258] sm:$0xff] }
 0x57f   : > { %2815 = vmatprep.subr.bf16.mxu0 %v2814_v11  ;;  %v1936_v11 = vld [vmem:[%s4265_s7 + $0x140] sm:$0xff] }
 0x580   : > { %v2848_v50 = vpack.c.bf16 %v1937_v27, %v1936_v11  ;;  %v2884_v11 = vpack.c.bf16 %v1971_v55, %v1970_v31 }
 0x582   : > { %2817 = vmatpush3.bf16.msra.mxu0 %v2816_v9  ;;  %v2850_v9 = vpack.c.bf16 %v1955_v48, %v1954_v53  ;;  %v1972_v53 = vld [vmem:[%s4265_s7 + $0x260] sm:$0xff]  ;;  %v1973_v48 = vld [vmem:[%s4265_s7 + $0x268] sm:$0xff] }
 0x583   : > { %2819 = vmatprep.subr.bf16.mxu0 %v2818_v45  ;;  %v1938_v45 = vld [vmem:[%s4265_s7 + $0x150] sm:$0xff] }
 0x584   : > { %v2852_v1 = vpack.c.bf16 %v1939_v34, %v1938_v45  ;;  %v2888_v45 = vpack.c.bf16 %v1973_v48, %v1972_v53 }
 0x586   : > { %2821 = vmatpush3.bf16.msra.mxu0 %v2820_v54  ;;  %v2854_v54 = vpack.c.bf16 %v1957_v51, %v1956_v49  ;;  %v1974_v49 = vld [vmem:[%s4265_s7 + $0x270] sm:$0xff]  ;;  %v1975_v51 = vld [vmem:[%s4265_s7 + $0x278] sm:$0xff] }
 0x587   : > { %2823 = vmatprep.subr.bf16.mxu0 %v2822_v37  ;;  %v1940_v37 = vld [vmem:[%s4265_s7 + $0x160] sm:$0xff] }
 0x588   : > { %v2856_v3 = vpack.c.bf16 %v1941_v63, %v1940_v37  ;;  %v1993_v37 = vld [vmem:[%s4265_s7 + $0x308] sm:$0xff] }
 0x58a   : > { %2825 = vmatpush3.bf16.msra.mxu0 %v2824_v57  ;;  %v2858_v57 = vpack.c.bf16 %v1959_v56, %v1958_v2  ;;  %v3223_v2 = vmov 0.0|0.0  }
 0x58b   : > { %2827 = vmatprep.subr.bf16.mxu0 %v2826_v5  ;;  %v1942_v5 = vld [vmem:[%s4265_s7 + $0x170] sm:$0xff] }
 0x58c   : > { %v2860_v44 = vpack.c.bf16 %v1943_v19, %v1942_v5  ;;  %v2423_v19 = vld [vmem:[%s4266_s8] ss:$0 sm:$0xff] }
 0x58e   : > { %2829 = vmatpush3.bf16.msra.mxu0 %v2828_v60  ;;  %v1977_v60 = vld [vmem:[%s4265_s7 + $0x288] sm:$0xff] }
 0x58f   : > { %2831 = vmatprep.subr.bf16.mxu0 %v2830_v6  ;;  %v2862_v29 = vpack.c.bf16 %v1977_v60, %v1976_v52  ;;  %v1960_v6 = vld [vmem:[%s4265_s7 + $0x200] sm:$0xff] }
 0x644   : > { %v2554_v40 = vpop.f32.mrb[24].mxu0 }
 0x645   : > { %v1853_v10 = vpop.f32.mrb[25].mxu0  ;;  %v1879_v14 = vrot.slane %v2554_v40, 2  ;;  %v1883_v22 = vrot.slane %v2554_v40, 4 }
 0x646   : > { %v1867_v59 = vrot.slane %v1853_v10, 4  ;;  %v1863_v16 = vrot.slane %v1853_v10, 2  ;;  %v1871_v47 = vrot.slane %v1853_v10, 6 }
 0x648   : > { %1868 = vrot.lane.b32.xlu1 %v1867_v59, %s3217_s28  ;;  %1864 = vrot.lane.b32.xlu0 %v1863_v16, %s3220_s22  ;;  %v1979_v59 = vld [vmem:[%s4265_s7 + $0x298] sm:$0xff]  ;;  %s2426_s22 = sshll.u32 %s3297_s13, 5  ;;  %s3225_s13 = smov [#allocation7]  }
 0x649   : > { %s4216_s27 = scalar_lea.hbm %s4267_s9, %s2426_s22  ;;  %s3138_s21 = sshll.u32 %s3225_s13, 4  ;;  %s3139_s21 = int_to_ptr.vmem [resolvable:$false] %s3138_s21 }
 0x64c   : > { %1872 = vrot.lane.b32.xlu0 %v1871_v47, %s3221_s23  ;;  %1876 = vrot.lane.b32.xlu1 %v2554_v40, %s3218_s29  ;;  %v1961_v40 = vld [vmem:[%s4265_s7 + $0x208] sm:$0xff]  ;;  %s355_s23 = scalar_lea.vmem [#allocation7], %s2387_s17  ;;  %s3140_s29 = scalar_lea.vmem %s3139_s21, 64 }
 0x650   : > { %1880 = vrot.lane.b32.xlu0 %v1879_v14, %s3222_s11  ;;  %1884 = vrot.lane.b32.xlu1 %v1883_v22, %s3215_s25  ;;  %v2864_v14 = vpack.c.bf16 %v1961_v40, %v1960_v6  ;;  %s2298_s11 = sshll.u32 %s355_s23, 4  ;;  %s4218_s11 = int_to_ptr.vmem [resolvable:$true] %s2298_s11 }
 0x651   : > { %s3134_s28 = scalar_lea.vmem %s4218_s11, 32  ;;  %p3141_p4 = scmp.lt.s32.totalorder %s4218_s11, %s3139_s21 }
 0x652   : > { %p3135_p12 = scmp.ne.s32.totalorder %s4218_s11, %s3134_s28  ;;  %p3142_p7 = scmp.lt.s32.totalorder %s3140_s29, %s3134_s28 }
 0x654   : > { %p3136_p2 = pnand %p3135_p12, %p4286_p1  ;;  %p3143_p8 = por %p3142_p7, %p3141_p4 }
 0x656   : > { %p3137_p3 = pneg %p3136_p2 }
 0x658   : > { %p3144_p11 = pnand %p3143_p8, %p3137_p3 }
 0x6ba   : > { %v4003_v7 = vpop.permute.xlu1 %1868  ;;  %v1865_v4 = vpop.permute.xlu0 %1864 }
 0x6bb   : > { %v1888_v46 = vsel %vm1887_vm0, %v1853_v10, %v1865_v4  ;;  %v1889_v61 = vsel %vm1187_vm11, %v1865_v4, %v4003_v7  ;;  %v1978_v10 = vld [vmem:[%s4265_s7 + $0x290] sm:$0xff]  ;;  %v1981_v4 = vld [vmem:[%s4265_s7 + $0x2a8] sm:$0xff] }
 0x6bc   : > { %2067 = vmatprep.mubr.f32.mxu0 %v1889_v61  ;;  %v2866_v22 = vpack.c.bf16 %v1979_v59, %v1978_v10  ;;  %v2870_v61 = vpack.c.bf16 %v1981_v4, %v1980_v62 }
 0x6bd   : > { %2068 = vmatmul.mubr.f32.vlgmr.msra.gmra.mrb[26].mxu0 %v1888_v46  ;;  %v2868_v46 = vpack.c.bf16 %v1963_v58, %v1962_v24 }
 0x6be   : > { %2833 = vmatpush3.bf16.msra.mxu0 %v2832_v32  ;;  %v4019_v38 = vpop.permute.xlu0 %1872  ;;  %v4021_v18 = vpop.permute.xlu1 %1876 }
 0x6bf   : > { %2835 = vmatprep.subr.bf16.mxu0 %v2834_v17  ;;  %v1892_v36 = vsel %vm1234_vm12, %v4019_v38, %v4021_v18  ;;  %v1891_v25 = vsel %vm1890_vm2, %v4003_v7, %v4019_v38  ;;  %v1964_v7 = vld [vmem:[%s4265_s7 + $0x220] sm:$0xff]  ;;  %v1965_v17 = vld [vmem:[%s4265_s7 + $0x228] sm:$0xff]  ;;  %v1966_v38 = vld [vmem:[%s4265_s7 + $0x230] sm:$0xff] }
 0x6c0   : > { %2137 = vmatprep.mubr.f32.mxu0 %v1892_v36  ;;  %v2872_v33 = vpack.c.bf16 %v1965_v17, %v1964_v7  ;;  %v1984_v36 = vld [vmem:[%s4265_s7 + $0x2c0] sm:$0xff] }
 0x6c2   : > { %2837 = vmatpush3.bf16.msra.mxu0 %v2836_v39  ;;  %v4110_v16 = vpop.permute.xlu0 %1880  ;;  %v4112_v47 = vpop.permute.xlu1 %1884  ;;  %v1967_v39 = vld [vmem:[%s4265_s7 + $0x238] sm:$0xff] }
 0x6c3   : > { %2839 = vmatprep.subr.bf16.mxu0 %v2838_v8  ;;  %v1895_v32 = vsel %vm909_vm6, %v4110_v16, %v4112_v47  ;;  %v1985_v8 = vld [vmem:[%s4265_s7 + $0x2c8] sm:$0xff]  ;;  %v2876_v20 = vpack.c.bf16 %v1967_v39, %v1966_v38  ;;  %v1894_v56 = vsel %vm1893_vm3, %v4021_v18, %v4110_v16 }
 0x6c4   : > { %v2878_v28 = vpack.c.bf16 %v1985_v8, %v1984_v36 }
 0x6c6   : > { %2841 = vmatpush3.bf16.msra.mxu0 %v2840_v12  ;;  %v1986_v12 = vld [vmem:[%s4265_s7 + $0x2d0] sm:$0xff] }
 0x6c7   : > { %2843 = vmatprep.subr.bf16.mxu0 %v2842_v43  ;;  %v1987_v43 = vld [vmem:[%s4265_s7 + $0x2d8] sm:$0xff] }
 0x6c8   : > { %v2882_v26 = vpack.c.bf16 %v1987_v43, %v1986_v12 }
 0x6ca   : > { %2845 = vmatpush3.bf16.msra.mxu0 %v2844_v21  ;;  %v1988_v21 = vld [vmem:[%s4265_s7 + $0x2e0] sm:$0xff] }
 0x6cb   : > { %2847 = vmatprep.subr.bf16.mxu0 %v2846_v41  ;;  %v1989_v41 = vld [vmem:[%s4265_s7 + $0x2e8] sm:$0xff] }
 0x6cc   : > { %v2886_v27 = vpack.c.bf16 %v1989_v41, %v1988_v21 }
 0x6ce   : > { %2849 = vmatpush3.bf16.msra.mxu0 %v2848_v50  ;;  %v1990_v50 = vld [vmem:[%s4265_s7 + $0x2f0] sm:$0xff] }
 0x6cf   : > { %2851 = vmatprep.subr.bf16.mxu0 %v2850_v9  ;;  %v1991_v9 = vld [vmem:[%s4265_s7 + $0x2f8] sm:$0xff] }
 0x6d0   : > { %v2890_v34 = vpack.c.bf16 %v1991_v9, %v1990_v50 }
 0x6d2   : > { %2853 = vmatpush3.bf16.msra.mxu0 %v2852_v1  ;;  %v2892_v1 = vpack.c.bf16 %v1975_v51, %v1974_v49 }
 0x6d3   : > { %2855 = vmatprep.subr.bf16.mxu0 %v2854_v54  ;;  %v1992_v54 = vld [vmem:[%s4265_s7 + $0x300] sm:$0xff] }
 0x6d4   : > { %v2895_v63 = vpack.c.bf16 %v1993_v37, %v1992_v54 }
 0x6d6   : > { %2857 = vmatpush3.bf16.msra.mxu0 %v2856_v3 }
 0x6d7   : > { %2859 = vmatprep.subr.bf16.mxu0 %v2858_v57 }
 0x6da   : > { %2861 = vmatpush3.bf16.msra.mxu0 %v2860_v44 }
 0x6db   : > { %2863 = vmatprep.subr.bf16.mxu0 %v2862_v29 }
 0x6dd   : > { %2138 = vmatmul.mubr.f32.vlgmr.msra.gmra.mrb[28].mxu0 %v1891_v25 }
 0x6de   : > { %2865 = vmatpush3.bf16.msra.mxu0 %v2864_v14  ;;  %2207 = vmatprep.mubr.f32.mxu0 %v1895_v32 }
 0x6df   : > { %2867 = vmatprep.subr.bf16.mxu0 %v2866_v22 }
 0x6e2   : > { %2869 = vmatpush3.bf16.msra.mxu0 %v2868_v46 }
 0x6e3   : > { %2871 = vmatprep.subr.bf16.mxu0 %v2870_v61 }
 0x6e6   : > { %2873 = vmatpush3.bf16.msra.mxu0 %v2872_v33 }
 0x6e7   : > { %2875 = vmatprep.subr.bf16.mxu0 %v2874_v13 }
 0x6ea   : > { %2877 = vmatpush3.bf16.msra.mxu0 %v2876_v20 }
 0x6eb   : > { %2879 = vmatprep.subr.bf16.mxu0 %v2878_v28 }
 0x6ee   : > { %2881 = vmatpush3.bf16.msra.mxu0 %v2880_v42 }
 0x6ef   : > { %2883 = vmatprep.subr.bf16.mxu0 %v2882_v26 }
 0x6f2   : > { %2885 = vmatpush3.bf16.msra.mxu0 %v2884_v11 }
 0x6f3   : > { %2887 = vmatprep.subr.bf16.mxu0 %v2886_v27 }
 0x6f6   : > { %2889 = vmatpush3.bf16.msra.mxu0 %v2888_v45 }
 0x6f7   : > { %2891 = vmatprep.subr.bf16.mxu0 %v2890_v34 }
 0x6fa   : > { %2893 = vmatpush3.bf16.msra.mxu0 %v2892_v1 }
 0x6fb   : > { %2894 = vmatprep.subr.bf16.mxu0 %v3223_v2 }
 0x6fd   : > { %2208 = vmatmul.mubr.f32.vlgmr.msra.gmra.mrb[30].mxu0 %v1894_v56 }
 0x6fe   : > { %2896 = vmatpush3.bf16.msra.mxu0 %v2895_v63  ;;  %2559 = vmatprep.mubr.msk.f32.mxu0 %vm3224_vm4, %v3212_v0 }
 0x701   : > { %2560 = vmatmul.mubr.msk.f32.vlgmr.msra.gmra.mrb[32].mxu0 %vm1742_vm14, %v4112_v47 }
 0x790   : > { %v2468_v3 = vpop.f32.mrb[26].mxu0 }
 0x791   : > { %v2469_v57 = vpop.f32.mrb[27].mxu0 }
 0x792   : > { %v2470_v5 = vadd.f32 %v2469_v57, %v2468_v3 }
 0x794   : > { %v2070_v44 = vadd.f32 %v2470_v5, %v2423_v19 }
 0x7b0   : > { %v2503_v52 = vpop.f32.mrb[28].mxu0 }
 0x7b1   : > { %v2504_v60 = vpop.f32.mrb[29].mxu0 }
 0x7b2   : > { %v2505_v18 = vadd.f32 %v2504_v60, %v2503_v52 }
 0x7b4   : > { %v2140_v29 = vadd.f32 %v2505_v18, %v2070_v44 }
 0x7d0   : > { %v2538_v6 = vpop.f32.mrb[30].mxu0 }
 0x7d1   : > { %v2539_v0 = vpop.f32.mrb[31].mxu0 }
 0x7d2   : > { %v2540_v40 = vadd.f32 %v2539_v0, %v2538_v6 }
 0x7d4   : > { %v2210_v10 = vadd.f32 %v2540_v40, %v2140_v29  ;;  %v2279_v59 = vpop.f32.mrb[32].mxu0 }
 0x7d5   : > { %v2561_v16 = vpop.f32.mrb[33].mxu0 }
 0x7d6   : > { %v2280_v47 = vadd.f32 %v2279_v59, %v2210_v10 }
 0x7d8   : > { %2283 = vst [vmem:[%s355_s23] sm:$0x3] %v2280_v47 }
 0x7d9   : > { %3147 = shalt.err (!%p3144_p11)
}
 0x7da   : > { %s3148_s26 = scalar_lea.hbm %s4216_s27, 32  ;;  %s3152_s16 = scalar_lea.hbm %s4267_s9, 64 }
 0x7db   : > { %p3149_p13 = scmp.ne.s32.totalorder %s4216_s27, %s3148_s26  ;;  %p3153_p6 = scmp.lt.u32.totalorder %s4216_s27, %s4267_s9 }
 0x7dc   : > { %p3154_p9 = scmp.lt.u32.totalorder %s3152_s16, %s3148_s26  ;;  %p3156_p12 = scmp.lt.u32.totalorder %s3148_s26, %s4216_s27 }
 0x7dd   : > { %p3150_p0 = pnand %p3149_p13, %p4286_p1 }
 0x7de   : > { %p3155_p10 = por %p3154_p9, %p3153_p6 }
 0x7df   : > { %p3151_p5 = pneg %p3150_p0 }
 0x7e0   : > { %p3157_p2 = por %p3156_p12, %p3155_p10 }
 0x7e2   : > { %p3158_p3 = pnand %p3157_p2, %p3151_p5 }
 0x7e4   : > { %3161 = shalt.err (!%p3158_p3)
}
 0x7e5   : > { %2929 = dma.vmem_to_hbm [thread:$0]  (%p4286_p1), %s4218_s11, 32, %s4216_s27, %s2285_s24  }
 0x7e6 PF: > { %p2946_p4 = scmp.ge.s32.totalorder %s3204_s12, 2  ;;  %s2310_s23 = sand.u32 1, %s3192_s30  }
 0x7e7   : > { %p4287_p7 = scmp.ne.s32.totalorder %s4278_s20, 0  ;;  %s2311_s15 = scalar_lea.sflag [#allocation4], %s2310_s23 }
 0x7e9   : > { %p2939_p8 = pnand %p2946_p4, %p4287_p7 }
 0x7eb   : > { %3187 = dma.done.wait (!%p2939_p8), %s2311_s15, 32  }
 0x7ec   : > { %3189 = vsyncadd (!%p2939_p8), %s2311_s15, 4294967264  ;;  %s4288_s12 = sld [smem:[#allocation12_spill]]  ;;  %s4289_s18 = sld [smem:[#allocation11_spill]] }
 0x7ed   : > { %s4290_s11 = sld [smem:[#allocation13_spill]]  ;;  %s4291_s30 = smov %s3196_s10 }
 0x7f2   : > { %p21_p11 = scmp.ge.s32.totalorder %s4288_s12, 4   ;;  %s4292_s10 = smov %s4289_s18 }
 0x7f4   :  { %23 = sbr.rel (!%p21_p11) target bundleno = 5 (0x5), region = 100 }
 0x7fb   :  { %2316 = vsyncpa [#allocation3], 1 }
 0x7fc   :  { %2318 = vsyncpa [#allocation3 + $0x1], 1 }
 0x7fd   :  { %2319 = vsyncpa [#allocation6], 1 }
 0x7fe   :  { %2320 = vsyncpa [#allocation4], 1 }
 0x7ff   :  { %2322 = vsyncpa [#allocation4 + $0x1], 1 }

</bundles_post_ra>
